<compile_context>
chip_gen: v6e
topology: v6e:2x2x1
jax: 0.10.0
libtpu: 0.0.40
codegen_flags: <defaults>
</compile_context>

<pallas_src>
import functools

import jax
import jax.numpy as jnp
from jax.experimental import pallas as pl
from jax.experimental.pallas import tpu as pltpu

_NEG_BIG = -1.0e30  # neighbor-logit pad value for non-existent (padded) nodes


def _round_up(x, m):
    return ((x + m - 1) // m) * m


def _cdiv(a, b):
    return (a + b - 1) // b


# ---------------------------------------------------------------------------
# Generation-aware configuration
# ---------------------------------------------------------------------------

def _vmem_capacity_bytes():
    """Physical per-core VMEM (128 MiB on v5e/v6e, 64 MiB per TC on v7x)."""
    try:
        return int(pltpu.get_tpu_info().vmem_capacity_bytes)
    except Exception:
        return 64 * 1024 * 1024  # unknown chip: assume the small (v7x) size


def _default_elementwise_dtype():
    """bf16 logits/exp pipeline on v6e/v7x (bf16 VPU/EUP paths); f32 elsewhere."""
    try:
        kind = jax.devices()[0].device_kind.lower()
    except Exception:
        return jnp.float32
    if "v6" in kind or "v7" in kind:
        return jnp.bfloat16
    return jnp.float32


def _choose_tiles(n, h, hf, hf_pad, budget_bytes, prefer_split_q):
    """Pick (tq, tj): q-row tile and neighbor tile fitting the VMEM budget."""

    def footprint(tq, tj):
        inputs = (2 * 2 * tq * h * 4      # ci + row_max blocks (double buffered)
                  + 2 * h * tj * 4        # cj_t block (double buffered)
                  + 2 * tj * hf * 4)      # Wh block (budgeted as f32)
        out = 2 * tq * hf_pad * 4
        scratch = tq * hf * 4 + tq * h * 4
        temps = 4 * tq * tj * 4 + 2 * tq * tj   # live logits-pipeline values
        return inputs + out + scratch + temps

    tq_cap = min(_round_up(n, 8), 1024)
    if prefer_split_q and n > 8:
        # keep >= 2 q tiles so the "parallel" axis can split across v7x's 2 cores
        tq_cap = min(tq_cap, max(8, _round_up(_cdiv(n, 2), 8)))
    tj_cap = min(_round_up(n, 128), 2048)

    tq_cands = [t for t in (1024, 512, 256, 128, 64, 32, 16, 8) if t <= tq_cap] or [8]
    tj_cands = [t for t in (2048, 1024, 512, 256, 128) if t <= tj_cap] or [128]

    for tq in tq_cands:
        for tj in tj_cands:
            if footprint(tq, tj) <= budget_bytes:
                return tq, tj
    return tq_cands[-1], tj_cands[-1]


# ---------------------------------------------------------------------------
# Kernel
# ---------------------------------------------------------------------------

def _gat_attention_kernel(ci_ref, m_ref, cj_ref, wh_ref, out_ref, acc_ref, den_ref,
                          *, H, F_out, HF, HF_pad, final, ew_dtype, approx_recip):
    """Attention + aggregation for one (q-row tile, neighbor tile) grid cell."""
    j = pl.program_id(1)

    @pl.when(j == 0)
    def _init():
        acc_ref[...] = jnp.zeros_like(acc_ref)
        den_ref[...] = jnp.zeros_like(den_ref)

    ci = ci_ref[...].astype(ew_dtype)   # (tq, H)  query-side score term
    m = m_ref[...].astype(ew_dtype)     # (tq, H)  exact per-row logit max
    cj = cj_ref[...].astype(ew_dtype)   # (H, tj)  neighbor-side score term
    wh = wh_ref[...]                    # (tj, HF) aggregation operand (matmul dtype)

    for hd in range(H):                 # static unroll, H is small
        z = ci[:, hd:hd + 1] + cj[hd:hd + 1, :]                 # (tq, tj)
        e = jnp.where(z > 0, z, z * 0.2)                        # LeakyReLU(0.2)
        pr = jnp.exp(e - m[:, hd:hd + 1])                       # stabilized, in (0, 1]
        den_ref[:, hd:hd + 1] += jnp.sum(pr.astype(jnp.float32), axis=1, keepdims=True)
        acc_ref[:, hd * F_out:(hd + 1) * F_out] += jnp.dot(
            pr.astype(wh.dtype), wh[:, hd * F_out:(hd + 1) * F_out],
            preferred_element_type=jnp.float32)

    @pl.when(j == pl.num_programs(1) - 1)
    def _finalize():
        acc = acc_ref[...]
        den = den_ref[...]
        inv = pl.reciprocal(den, approx=approx_recip)           # (tq, H)
        parts = []
        for hd in range(H):
            hp = acc[:, hd * F_out:(hd + 1) * F_out] * inv[:, hd:hd + 1]
            # ELU; clamp so the unselected exp branch can never overflow.
            hp = jnp.where(hp > 0, hp, jnp.exp(jnp.minimum(hp, 0.0)) - 1.0)
            parts.append(hp)
        row = parts[0] if H == 1 else jnp.concatenate(parts, axis=1)   # (tq, HF) f32
        if final:
            # log_softmax over the feature dim (dim=1), computed in f32 in-register.
            mm = jnp.max(row, axis=1, keepdims=True)
            row = row - (jnp.log(jnp.sum(jnp.exp(row - mm), axis=1, keepdims=True)) + mm)
        if HF_pad > HF:
            row = jnp.concatenate(
                [row, jnp.zeros((row.shape[0], HF_pad - HF), row.dtype)], axis=1)
        out_ref[...] = row.astype(out_ref.dtype)                # one dense store


# ---------------------------------------------------------------------------
# Layer wrapper
# ---------------------------------------------------------------------------

def gat_layer(h, pos, W_heads, a_heads, *, final=False,
              matmul_dtype=jnp.bfloat16, elementwise_dtype=None,
              approx_reciprocal=True):
    """All heads of one SpatialAttentionLayer stack.

    h: (N, F_in), pos: (N, 3), W_heads: (H, F_in, F_out), a_heads: (H, 2*F_out+3, 1)
    returns (N, H*F_out) == torch.cat([head_h(h, pos) for h], dim=1).
    """
    H, F_in, F_out = W_heads.shape
    N = h.shape[0]
    HF = H * F_out
    HF_pad = max(128, _round_up(HF, 128))           # lane-dense output slab

    ew_dtype = elementwise_dtype or _default_elementwise_dtype()

    # ---- generation-aware VMEM budget and tiling ------------------------------
    vmem_cap = _vmem_capacity_bytes()
    vmem_limit = int(vmem_cap * 0.75)               # 96 MiB v5e/v6e, 48 MiB v7x
    prefer_split_q = vmem_cap <= 96 * 1024 * 1024   # 64 MiB VMEM => v7x (2 TCs/chip)
    tq, tj = _choose_tiles(N, H, HF, HF_pad, int(vmem_limit * 0.6), prefer_split_q)

    # ---- hoisted per-layer preprocessing (plain XLA, O(N) work) ---------------
    # Fused projection for all heads: Wh[:, hd*F_out:(hd+1)*F_out] = h @ W_heads[hd].
    W_all = jnp.transpose(W_heads, (1, 0, 2)).reshape(F_in, HF)
    Wh = jnp.dot(h.astype(jnp.float32), W_all.astype(jnp.float32))      # (N, HF)

    a_flat = a_heads[..., 0]                        # (H, 2*F_out + 3)
    aj = a_flat[:, :F_out]                          # weights for Wh[j] (neighbor term)
    ai = a_flat[:, F_out:2 * F_out]                 # weights for Wh[i] (query term)
    ap = a_flat[:, 2 * F_out:]                      # weights for pos[i] - pos[j], (H, 3)

    Wh3 = Wh.reshape(N, H, F_out)
    pos_term = pos @ ap.T                           # (N, H)
    ci = jnp.einsum('nhf,hf->nh', Wh3, ai) + pos_term       # query-side score term
    cj = jnp.einsum('nhf,hf->nh', Wh3, aj) - pos_term       # neighbor-side score term
    # Exact per-row logit max: LeakyReLU monotone => max_j lrelu(ci+cj[j]) = lrelu(ci+max_j cj)
    zmax = ci + jnp.max(cj, axis=0, keepdims=True)
    row_max = jnp.where(zmax > 0, zmax, 0.2 * zmax)          # (N, H)

    # ---- neighbor-axis padding so the j grid divides exactly ------------------
    Nj = _round_up(N, tj)
    cj_t = cj.T                                              # (H, N), lane-major
    wh_n = Wh.astype(matmul_dtype)                           # aggregation operand
    if Nj > N:
        cj_t = jnp.concatenate(
            [cj_t, jnp.full((H, Nj - N), _NEG_BIG, cj_t.dtype)], axis=1)
        wh_n = jnp.concatenate(
            [wh_n, jnp.zeros((Nj - N, HF), wh_n.dtype)], axis=0)

    nq = _cdiv(N, tq)
    nj = Nj // tj

    kernel = functools.partial(
        _gat_attention_kernel, H=H, F_out=F_out, HF=HF, HF_pad=HF_pad,
        final=final, ew_dtype=ew_dtype, approx_recip=approx_reciprocal)

    cost = pl.CostEstimate(
        flops=int(2 * nq * tq * Nj * HF + 6 * nq * tq * Nj * H),
        transcendentals=int(nq * tq * Nj * H + N * HF),
        bytes_accessed=int(4 * N * 2 * H + 4 * nq * H * Nj
                           + jnp.dtype(matmul_dtype).itemsize * nq * Nj * HF
                           + 4 * N * HF_pad),
    )

    out_pad = pl.pallas_call(
        kernel,
        out_shape=jax.ShapeDtypeStruct((N, HF_pad), jnp.float32),
        grid_spec=pltpu.PrefetchScalarGridSpec(
            num_scalar_prefetch=0,
            grid=(nq, nj),
            in_specs=[
                pl.BlockSpec((tq, H), lambda i, j: (i, 0)),    # ci (q tile)
                pl.BlockSpec((tq, H), lambda i, j: (i, 0)),    # row_max (q tile)
                pl.BlockSpec((H, tj), lambda i, j: (0, j)),    # cj_t (neighbor tile)
                pl.BlockSpec((tj, HF), lambda i, j: (j, 0)),   # Wh (neighbor tile)
            ],
            out_specs=pl.BlockSpec((tq, HF_pad), lambda i, j: (i, 0)),
            scratch_shapes=[pltpu.VMEM((tq, HF), jnp.float32),   # running weighted sum
                            pltpu.VMEM((tq, H), jnp.float32)],   # running softmax denom
        ),
        compiler_params=pltpu.CompilerParams(
            dimension_semantics=("parallel", "arbitrary"),
            vmem_limit_bytes=vmem_limit,
        ),
        cost_estimate=cost,
    )(ci, row_max, cj_t, wh_n)

    return out_pad[:, :HF]                                   # drop lane padding


def spatial_gat_forward(x, pos, params, *, matmul_dtype=jnp.bfloat16,
                        elementwise_dtype=None, approx_reciprocal=True):
    """SpatialGAT.forward (eval mode: all dropout layers are identity)."""
    pos = pos.reshape(pos.shape[0], 3)           # accept (N, 3) or (N, 1, 3)
    hidden = gat_layer(x, pos, params["W_heads"], params["a_heads"], final=False,
                       matmul_dtype=matmul_dtype, elementwise_dtype=elementwise_dtype,
                       approx_reciprocal=approx_reciprocal)
    return gat_layer(hidden, pos, params["W_out"][None], params["a_out"][None],
                     final=True, matmul_dtype=matmul_dtype,
                     elementwise_dtype=elementwise_dtype,
                     approx_reciprocal=approx_reciprocal)


# ---------------------------------------------------------------------------
# Parameter init (matches nn.init.xavier_uniform_(gain=1.414))
# ---------------------------------------------------------------------------

def _xavier_uniform(key, shape, gain=1.414):
    fan_in, fan_out = shape[0], shape[1]
    bound = gain * (6.0 / (fan_in + fan_out)) ** 0.5
    return jax.random.uniform(key, shape, jnp.float32, -bound, bound)


def init_params(key, nfeat, nhid, nclass, nheads):
    keys = jax.random.split(key, 2 * nheads + 2)
    W_heads = jnp.stack(
        [_xavier_uniform(keys[i], (nfeat, nhid)) for i in range(nheads)])
    a_heads = jnp.stack(
        [_xavier_uniform(keys[nheads + i], (2 * nhid + 3, 1)) for i in range(nheads)])
    W_out = _xavier_uniform(keys[-2], (nhid * nheads, nclass))
    a_out = _xavier_uniform(keys[-1], (2 * nclass + 3, 1))
    return {"W_heads": W_heads, "a_heads": a_heads, "W_out": W_out, "a_out": a_out}


if __name__ == "__main__":
    N, nfeat, nhid, nclass, nheads = 16, 16, 8, 4, 8

    root = jax.random.PRNGKey(0)
    k_x, k_pos, k_params = jax.random.split(root, 3)

    x = jax.random.normal(k_x, (N, nfeat), dtype=jnp.float32)
    pos = jax.random.normal(k_pos, (N, 3), dtype=jnp.float32)
    params = init_params(k_params, nfeat, nhid, nclass, nheads)

    fwd = jax.jit(spatial_gat_forward)
    out = jax.block_until_ready(fwd(x, pos, params))

    assert out.shape == (N, nclass)
    assert bool(jnp.all(jnp.isfinite(out)))
    # log_softmax rows must normalize (computed in f32 inside the kernel).
    row_sums = jnp.sum(jnp.exp(out), axis=1)
    assert bool(jnp.all(jnp.abs(row_sums - 1.0) < 1e-3))
    print("KERNEL_OK")
</pallas_src>

<mosaic_0001>
module attributes {stable_mosaic.version = 11 : i64} {
  func.func @_gat_attention_kernel(%arg0: i32, %arg1: i32, %arg2: memref<8x8xf32, #tpu.memory_space<vmem>>, %arg3: memref<8x8xf32, #tpu.memory_space<vmem>>, %arg4: memref<8x128xf32, #tpu.memory_space<vmem>>, %arg5: memref<128x64xbf16, #tpu.memory_space<vmem>>, %arg6: memref<8x128xf32, #tpu.memory_space<vmem>>, %arg7: memref<8x64xf32, #tpu.memory_space<vmem>>, %arg8: memref<8x8xf32, #tpu.memory_space<vmem>>) attributes {dimension_semantics = [#tpu.dimension_semantics<parallel>, #tpu.dimension_semantics<arbitrary>], iteration_bounds = array<i64: 2, 1>, scalar_prefetch = 0 : i64, scratch_operands = 2 : i64, tpu.core_type = #tpu.core_type<tc>, window_params = [{transform_indices = @transform_0, window_bounds = array<i64: 8, 8>}, {transform_indices = @transform_1, window_bounds = array<i64: 8, 8>}, {transform_indices = @transform_2, window_bounds = array<i64: 8, 128>}, {transform_indices = @transform_3, window_bounds = array<i64: 128, 64>}, {transform_indices = @transform_4, window_bounds = array<i64: 8, 128>}]} {
    %c0_i32 = arith.constant 0 : i32
    %0 = arith.cmpi eq, %arg1, %c0_i32 : i32
    %1 = arith.extui %0 : i1 to i32
    %c0_i32_0 = arith.constant 0 : i32
    %2 = arith.cmpi ne, %1, %c0_i32_0 : i32
    scf.if %2 {
      %cst_91 = arith.constant 0.000000e+00 : f32
      %210 = vector.broadcast %cst_91 : f32 to vector<8x64xf32>
      %c0_92 = arith.constant 0 : index
      %c0_93 = arith.constant 0 : index
      %211 = vector.load %arg7[%c0_92, %c0_93] : memref<8x64xf32, #tpu.memory_space<vmem>>, vector<8x64xf32>
      tpu.vector_store %arg7[%c0_92, %c0_93], %210 {strides = array<i32>} : memref<8x64xf32, #tpu.memory_space<vmem>>, vector<8x64xf32>,
      %cst_94 = arith.constant 0.000000e+00 : f32
      %212 = vector.broadcast %cst_94 : f32 to vector<8x8xf32>
      %c0_95 = arith.constant 0 : index
      %c0_96 = arith.constant 0 : index
      %213 = vector.load %arg8[%c0_95, %c0_96] : memref<8x8xf32, #tpu.memory_space<vmem>>, vector<8x8xf32>
      tpu.vector_store %arg8[%c0_95, %c0_96], %212 {strides = array<i32>} : memref<8x8xf32, #tpu.memory_space<vmem>>, vector<8x8xf32>,
    } else {
    }
    %c0 = arith.constant 0 : index
    %c0_1 = arith.constant 0 : index
    %3 = vector.load %arg2[%c0, %c0_1] : memref<8x8xf32, #tpu.memory_space<vmem>>, vector<8x8xf32>
    %c0_2 = arith.constant 0 : index
    %c0_3 = arith.constant 0 : index
    %4 = vector.load %arg3[%c0_2, %c0_3] : memref<8x8xf32, #tpu.memory_space<vmem>>, vector<8x8xf32>
    %c0_4 = arith.constant 0 : index
    %c0_5 = arith.constant 0 : index
    %5 = vector.load %arg4[%c0_4, %c0_5] : memref<8x128xf32, #tpu.memory_space<vmem>>, vector<8x128xf32>
    %c0_6 = arith.constant 0 : index
    %c0_7 = arith.constant 0 : index
    %6 = vector.load %arg5[%c0_6, %c0_7] : memref<128x64xbf16, #tpu.memory_space<vmem>>, vector<128x64xbf16>
    %7 = vector.extract_strided_slice %3 {offsets = [0, 0], sizes = [8, 1], strides = [1, 1]} : vector<8x8xf32> to vector<8x1xf32>
    %8 = vector.extract_strided_slice %5 {offsets = [0, 0], sizes = [1, 128], strides = [1, 1]} : vector<8x128xf32> to vector<1x128xf32>
    %9 = vector.broadcast %7 : vector<8x1xf32> to vector<8x128xf32>
    %10 = vector.broadcast %8 : vector<1x128xf32> to vector<8x128xf32>
    %11 = arith.addf %9, %10 : vector<8x128xf32>
    %cst = arith.constant 0.000000e+00 : f32
    %12 = vector.broadcast %cst : f32 to vector<8x128xf32>
    %13 = arith.cmpf ogt, %11, %12 : vector<8x128xf32>
    %cst_8 = arith.constant 2.000000e-01 : f32
    %14 = vector.broadcast %cst_8 : f32 to vector<8x128xf32>
    %15 = arith.mulf %11, %14 : vector<8x128xf32>
    %16 = arith.select %13, %11, %15 : vector<8x128xi1>, vector<8x128xf32>
    %17 = vector.extract_strided_slice %4 {offsets = [0, 0], sizes = [8, 1], strides = [1, 1]} : vector<8x8xf32> to vector<8x1xf32>
    %18 = vector.broadcast %17 : vector<8x1xf32> to vector<8x128xf32>
    %19 = arith.subf %16, %18 : vector<8x128xf32>
    %20 = math.exp %19 : vector<8x128xf32>
    %c0_9 = arith.constant 0 : index
    %c0_10 = arith.constant 0 : index
    %21 = vector.load %arg8[%c0_9, %c0_10] : memref<8x8xf32, #tpu.memory_space<vmem>>, vector<8x1xf32>
    %cst_11 = arith.constant dense<0.000000e+00> : vector<8xf32>
    %22 = vector.multi_reduction <add>, %20, %cst_11 [1] : vector<8x128xf32> to vector<8xf32>
    %23 = vector.shape_cast %22 : vector<8xf32> to vector<8x1xf32>
    %24 = arith.addf %21, %23 : vector<8x1xf32>
    %c0_12 = arith.constant 0 : index
    %c0_13 = arith.constant 0 : index
    %25 = vector.load %arg8[%c0_12, %c0_13] : memref<8x8xf32, #tpu.memory_space<vmem>>, vector<8x1xf32>
    tpu.vector_store %arg8[%c0_12, %c0_13], %24 {strides = array<i32>} : memref<8x8xf32, #tpu.memory_space<vmem>>, vector<8x1xf32>,
    %c0_14 = arith.constant 0 : index
    %c0_15 = arith.constant 0 : index
    %26 = vector.load %arg7[%c0_14, %c0_15] : memref<8x64xf32, #tpu.memory_space<vmem>>, vector<8x8xf32>
    %27 = arith.truncf %20 : vector<8x128xf32> to vector<8x128xbf16>
    %28 = vector.extract_strided_slice %6 {offsets = [0, 0], sizes = [128, 8], strides = [1, 1]} : vector<128x64xbf16> to vector<128x8xbf16>
    %cst_16 = arith.constant dense<0.000000e+00> : vector<8x8xf32>
    %29 = tpu.matmul %27, %28, %cst_16 {dimension_numbers = #tpu.dot_dimension_numbers<[1], [0], [0], [1], [0, 0, 1, 1], [], []>} : vector<8x128xbf16>, vector<128x8xbf16>, vector<8x8xf32> -> vector<8x8xf32>
    %30 = arith.addf %26, %29 : vector<8x8xf32>
    %c0_17 = arith.constant 0 : index
    %c0_18 = arith.constant 0 : index
    %31 = vector.load %arg7[%c0_17, %c0_18] : memref<8x64xf32, #tpu.memory_space<vmem>>, vector<8x8xf32>
    tpu.vector_store %arg7[%c0_17, %c0_18], %30 {strides = array<i32>} : memref<8x64xf32, #tpu.memory_space<vmem>>, vector<8x8xf32>,
    %32 = vector.extract_strided_slice %3 {offsets = [0, 1], sizes = [8, 1], strides = [1, 1]} : vector<8x8xf32> to vector<8x1xf32>
    %33 = vector.extract_strided_slice %5 {offsets = [1, 0], sizes = [1, 128], strides = [1, 1]} : vector<8x128xf32> to vector<1x128xf32>
    %34 = vector.broadcast %32 : vector<8x1xf32> to vector<8x128xf32>
    %35 = vector.broadcast %33 : vector<1x128xf32> to vector<8x128xf32>
    %36 = arith.addf %34, %35 : vector<8x128xf32>
    %cst_19 = arith.constant 0.000000e+00 : f32
    %37 = vector.broadcast %cst_19 : f32 to vector<8x128xf32>
    %38 = arith.cmpf ogt, %36, %37 : vector<8x128xf32>
    %cst_20 = arith.constant 2.000000e-01 : f32
    %39 = vector.broadcast %cst_20 : f32 to vector<8x128xf32>
    %40 = arith.mulf %36, %39 : vector<8x128xf32>
    %41 = arith.select %38, %36, %40 : vector<8x128xi1>, vector<8x128xf32>
    %42 = vector.extract_strided_slice %4 {offsets = [0, 1], sizes = [8, 1], strides = [1, 1]} : vector<8x8xf32> to vector<8x1xf32>
    %43 = vector.broadcast %42 : vector<8x1xf32> to vector<8x128xf32>
    %44 = arith.subf %41, %43 : vector<8x128xf32>
    %45 = math.exp %44 : vector<8x128xf32>
    %c0_21 = arith.constant 0 : index
    %c1 = arith.constant 1 : index
    %46 = vector.load %arg8[%c0_21, %c1] : memref<8x8xf32, #tpu.memory_space<vmem>>, vector<8x1xf32>
    %cst_22 = arith.constant dense<0.000000e+00> : vector<8xf32>
    %47 = vector.multi_reduction <add>, %45, %cst_22 [1] : vector<8x128xf32> to vector<8xf32>
    %48 = vector.shape_cast %47 : vector<8xf32> to vector<8x1xf32>
    %49 = arith.addf %46, %48 : vector<8x1xf32>
    %c0_23 = arith.constant 0 : index
    %c1_24 = arith.constant 1 : index
    %50 = vector.load %arg8[%c0_23, %c1_24] : memref<8x8xf32, #tpu.memory_space<vmem>>, vector<8x1xf32>
    tpu.vector_store %arg8[%c0_23, %c1_24], %49 {strides = array<i32>} : memref<8x8xf32, #tpu.memory_space<vmem>>, vector<8x1xf32>,
    %c0_25 = arith.constant 0 : index
    %c8 = arith.constant 8 : index
    %51 = vector.load %arg7[%c0_25, %c8] : memref<8x64xf32, #tpu.memory_space<vmem>>, vector<8x8xf32>
    %52 = arith.truncf %45 : vector<8x128xf32> to vector<8x128xbf16>
    %53 = vector.extract_strided_slice %6 {offsets = [0, 8], sizes = [128, 8], strides = [1, 1]} : vector<128x64xbf16> to vector<128x8xbf16>
    %cst_26 = arith.constant dense<0.000000e+00> : vector<8x8xf32>
    %54 = tpu.matmul %52, %53, %cst_26 {dimension_numbers = #tpu.dot_dimension_numbers<[1], [0], [0], [1], [0, 0, 1, 1], [], []>} : vector<8x128xbf16>, vector<128x8xbf16>, vector<8x8xf32> -> vector<8x8xf32>
    %55 = arith.addf %51, %54 : vector<8x8xf32>
    %c0_27 = arith.constant 0 : index
    %c8_28 = arith.constant 8 : index
    %56 = vector.load %arg7[%c0_27, %c8_28] : memref<8x64xf32, #tpu.memory_space<vmem>>, vector<8x8xf32>
    tpu.vector_store %arg7[%c0_27, %c8_28], %55 {strides = array<i32>} : memref<8x64xf32, #tpu.memory_space<vmem>>, vector<8x8xf32>,
    %57 = vector.extract_strided_slice %3 {offsets = [0, 2], sizes = [8, 1], strides = [1, 1]} : vector<8x8xf32> to vector<8x1xf32>
    %58 = vector.extract_strided_slice %5 {offsets = [2, 0], sizes = [1, 128], strides = [1, 1]} : vector<8x128xf32> to vector<1x128xf32>
    %59 = vector.broadcast %57 : vector<8x1xf32> to vector<8x128xf32>
    %60 = vector.broadcast %58 : vector<1x128xf32> to vector<8x128xf32>
    %61 = arith.addf %59, %60 : vector<8x128xf32>
    %cst_29 = arith.constant 0.000000e+00 : f32
    %62 = vector.broadcast %cst_29 : f32 to vector<8x128xf32>
    %63 = arith.cmpf ogt, %61, %62 : vector<8x128xf32>
    %cst_30 = arith.constant 2.000000e-01 : f32
    %64 = vector.broadcast %cst_30 : f32 to vector<8x128xf32>
    %65 = arith.mulf %61, %64 : vector<8x128xf32>
    %66 = arith.select %63, %61, %65 : vector<8x128xi1>, vector<8x128xf32>
    %67 = vector.extract_strided_slice %4 {offsets = [0, 2], sizes = [8, 1], strides = [1, 1]} : vector<8x8xf32> to vector<8x1xf32>
    %68 = vector.broadcast %67 : vector<8x1xf32> to vector<8x128xf32>
    %69 = arith.subf %66, %68 : vector<8x128xf32>
    %70 = math.exp %69 : vector<8x128xf32>
    %c0_31 = arith.constant 0 : index
    %c2 = arith.constant 2 : index
    %71 = vector.load %arg8[%c0_31, %c2] : memref<8x8xf32, #tpu.memory_space<vmem>>, vector<8x1xf32>
    %cst_32 = arith.constant dense<0.000000e+00> : vector<8xf32>
    %72 = vector.multi_reduction <add>, %70, %cst_32 [1] : vector<8x128xf32> to vector<8xf32>
    %73 = vector.shape_cast %72 : vector<8xf32> to vector<8x1xf32>
    %74 = arith.addf %71, %73 : vector<8x1xf32>
    %c0_33 = arith.constant 0 : index
    %c2_34 = arith.constant 2 : index
    %75 = vector.load %arg8[%c0_33, %c2_34] : memref<8x8xf32, #tpu.memory_space<vmem>>, vector<8x1xf32>
    tpu.vector_store %arg8[%c0_33, %c2_34], %74 {strides = array<i32>} : memref<8x8xf32, #tpu.memory_space<vmem>>, vector<8x1xf32>,
    %c0_35 = arith.constant 0 : index
    %c16 = arith.constant 16 : index
    %76 = vector.load %arg7[%c0_35, %c16] : memref<8x64xf32, #tpu.memory_space<vmem>>, vector<8x8xf32>
    %77 = arith.truncf %70 : vector<8x128xf32> to vector<8x128xbf16>
    %78 = vector.extract_strided_slice %6 {offsets = [0, 16], sizes = [128, 8], strides = [1, 1]} : vector<128x64xbf16> to vector<128x8xbf16>
    %cst_36 = arith.constant dense<0.000000e+00> : vector<8x8xf32>
    %79 = tpu.matmul %77, %78, %cst_36 {dimension_numbers = #tpu.dot_dimension_numbers<[1], [0], [0], [1], [0, 0, 1, 1], [], []>} : vector<8x128xbf16>, vector<128x8xbf16>, vector<8x8xf32> -> vector<8x8xf32>
    %80 = arith.addf %76, %79 : vector<8x8xf32>
    %c0_37 = arith.constant 0 : index
    %c16_38 = arith.constant 16 : index
    %81 = vector.load %arg7[%c0_37, %c16_38] : memref<8x64xf32, #tpu.memory_space<vmem>>, vector<8x8xf32>
    tpu.vector_store %arg7[%c0_37, %c16_38], %80 {strides = array<i32>} : memref<8x64xf32, #tpu.memory_space<vmem>>, vector<8x8xf32>,
    %82 = vector.extract_strided_slice %3 {offsets = [0, 3], sizes = [8, 1], strides = [1, 1]} : vector<8x8xf32> to vector<8x1xf32>
    %83 = vector.extract_strided_slice %5 {offsets = [3, 0], sizes = [1, 128], strides = [1, 1]} : vector<8x128xf32> to vector<1x128xf32>
    %84 = vector.broadcast %82 : vector<8x1xf32> to vector<8x128xf32>
    %85 = vector.broadcast %83 : vector<1x128xf32> to vector<8x128xf32>
    %86 = arith.addf %84, %85 : vector<8x128xf32>
    %cst_39 = arith.constant 0.000000e+00 : f32
    %87 = vector.broadcast %cst_39 : f32 to vector<8x128xf32>
    %88 = arith.cmpf ogt, %86, %87 : vector<8x128xf32>
    %cst_40 = arith.constant 2.000000e-01 : f32
    %89 = vector.broadcast %cst_40 : f32 to vector<8x128xf32>
    %90 = arith.mulf %86, %89 : vector<8x128xf32>
    %91 = arith.select %88, %86, %90 : vector<8x128xi1>, vector<8x128xf32>
    %92 = vector.extract_strided_slice %4 {offsets = [0, 3], sizes = [8, 1], strides = [1, 1]} : vector<8x8xf32> to vector<8x1xf32>
    %93 = vector.broadcast %92 : vector<8x1xf32> to vector<8x128xf32>
    %94 = arith.subf %91, %93 : vector<8x128xf32>
    %95 = math.exp %94 : vector<8x128xf32>
    %c0_41 = arith.constant 0 : index
    %c3 = arith.constant 3 : index
    %96 = vector.load %arg8[%c0_41, %c3] : memref<8x8xf32, #tpu.memory_space<vmem>>, vector<8x1xf32>
    %cst_42 = arith.constant dense<0.000000e+00> : vector<8xf32>
    %97 = vector.multi_reduction <add>, %95, %cst_42 [1] : vector<8x128xf32> to vector<8xf32>
    %98 = vector.shape_cast %97 : vector<8xf32> to vector<8x1xf32>
    %99 = arith.addf %96, %98 : vector<8x1xf32>
    %c0_43 = arith.constant 0 : index
    %c3_44 = arith.constant 3 : index
    %100 = vector.load %arg8[%c0_43, %c3_44] : memref<8x8xf32, #tpu.memory_space<vmem>>, vector<8x1xf32>
    tpu.vector_store %arg8[%c0_43, %c3_44], %99 {strides = array<i32>} : memref<8x8xf32, #tpu.memory_space<vmem>>, vector<8x1xf32>,
    %c0_45 = arith.constant 0 : index
    %c24 = arith.constant 24 : index
    %101 = vector.load %arg7[%c0_45, %c24] : memref<8x64xf32, #tpu.memory_space<vmem>>, vector<8x8xf32>
    %102 = arith.truncf %95 : vector<8x128xf32> to vector<8x128xbf16>
    %103 = vector.extract_strided_slice %6 {offsets = [0, 24], sizes = [128, 8], strides = [1, 1]} : vector<128x64xbf16> to vector<128x8xbf16>
    %cst_46 = arith.constant dense<0.000000e+00> : vector<8x8xf32>
    %104 = tpu.matmul %102, %103, %cst_46 {dimension_numbers = #tpu.dot_dimension_numbers<[1], [0], [0], [1], [0, 0, 1, 1], [], []>} : vector<8x128xbf16>, vector<128x8xbf16>, vector<8x8xf32> -> vector<8x8xf32>
    %105 = arith.addf %101, %104 : vector<8x8xf32>
    %c0_47 = arith.constant 0 : index
    %c24_48 = arith.constant 24 : index
    %106 = vector.load %arg7[%c0_47, %c24_48] : memref<8x64xf32, #tpu.memory_space<vmem>>, vector<8x8xf32>
    tpu.vector_store %arg7[%c0_47, %c24_48], %105 {strides = array<i32>} : memref<8x64xf32, #tpu.memory_space<vmem>>, vector<8x8xf32>,
    %107 = vector.extract_strided_slice %3 {offsets = [0, 4], sizes = [8, 1], strides = [1, 1]} : vector<8x8xf32> to vector<8x1xf32>
    %108 = vector.extract_strided_slice %5 {offsets = [4, 0], sizes = [1, 128], strides = [1, 1]} : vector<8x128xf32> to vector<1x128xf32>
    %109 = vector.broadcast %107 : vector<8x1xf32> to vector<8x128xf32>
    %110 = vector.broadcast %108 : vector<1x128xf32> to vector<8x128xf32>
    %111 = arith.addf %109, %110 : vector<8x128xf32>
    %cst_49 = arith.constant 0.000000e+00 : f32
    %112 = vector.broadcast %cst_49 : f32 to vector<8x128xf32>
    %113 = arith.cmpf ogt, %111, %112 : vector<8x128xf32>
    %cst_50 = arith.constant 2.000000e-01 : f32
    %114 = vector.broadcast %cst_50 : f32 to vector<8x128xf32>
    %115 = arith.mulf %111, %114 : vector<8x128xf32>
    %116 = arith.select %113, %111, %115 : vector<8x128xi1>, vector<8x128xf32>
    %117 = vector.extract_strided_slice %4 {offsets = [0, 4], sizes = [8, 1], strides = [1, 1]} : vector<8x8xf32> to vector<8x1xf32>
    %118 = vector.broadcast %117 : vector<8x1xf32> to vector<8x128xf32>
    %119 = arith.subf %116, %118 : vector<8x128xf32>
    %120 = math.exp %119 : vector<8x128xf32>
    %c0_51 = arith.constant 0 : index
    %c4 = arith.constant 4 : index
    %121 = vector.load %arg8[%c0_51, %c4] : memref<8x8xf32, #tpu.memory_space<vmem>>, vector<8x1xf32>
    %cst_52 = arith.constant dense<0.000000e+00> : vector<8xf32>
    %122 = vector.multi_reduction <add>, %120, %cst_52 [1] : vector<8x128xf32> to vector<8xf32>
    %123 = vector.shape_cast %122 : vector<8xf32> to vector<8x1xf32>
    %124 = arith.addf %121, %123 : vector<8x1xf32>
    %c0_53 = arith.constant 0 : index
    %c4_54 = arith.constant 4 : index
    %125 = vector.load %arg8[%c0_53, %c4_54] : memref<8x8xf32, #tpu.memory_space<vmem>>, vector<8x1xf32>
    tpu.vector_store %arg8[%c0_53, %c4_54], %124 {strides = array<i32>} : memref<8x8xf32, #tpu.memory_space<vmem>>, vector<8x1xf32>,
    %c0_55 = arith.constant 0 : index
    %c32 = arith.constant 32 : index
    %126 = vector.load %arg7[%c0_55, %c32] : memref<8x64xf32, #tpu.memory_space<vmem>>, vector<8x8xf32>
    %127 = arith.truncf %120 : vector<8x128xf32> to vector<8x128xbf16>
    %128 = vector.extract_strided_slice %6 {offsets = [0, 32], sizes = [128, 8], strides = [1, 1]} : vector<128x64xbf16> to vector<128x8xbf16>
    %cst_56 = arith.constant dense<0.000000e+00> : vector<8x8xf32>
    %129 = tpu.matmul %127, %128, %cst_56 {dimension_numbers = #tpu.dot_dimension_numbers<[1], [0], [0], [1], [0, 0, 1, 1], [], []>} : vector<8x128xbf16>, vector<128x8xbf16>, vector<8x8xf32> -> vector<8x8xf32>
    %130 = arith.addf %126, %129 : vector<8x8xf32>
    %c0_57 = arith.constant 0 : index
    %c32_58 = arith.constant 32 : index
    %131 = vector.load %arg7[%c0_57, %c32_58] : memref<8x64xf32, #tpu.memory_space<vmem>>, vector<8x8xf32>
    tpu.vector_store %arg7[%c0_57, %c32_58], %130 {strides = array<i32>} : memref<8x64xf32, #tpu.memory_space<vmem>>, vector<8x8xf32>,
    %132 = vector.extract_strided_slice %3 {offsets = [0, 5], sizes = [8, 1], strides = [1, 1]} : vector<8x8xf32> to vector<8x1xf32>
    %133 = vector.extract_strided_slice %5 {offsets = [5, 0], sizes = [1, 128], strides = [1, 1]} : vector<8x128xf32> to vector<1x128xf32>
    %134 = vector.broadcast %132 : vector<8x1xf32> to vector<8x128xf32>
    %135 = vector.broadcast %133 : vector<1x128xf32> to vector<8x128xf32>
    %136 = arith.addf %134, %135 : vector<8x128xf32>
    %cst_59 = arith.constant 0.000000e+00 : f32
    %137 = vector.broadcast %cst_59 : f32 to vector<8x128xf32>
    %138 = arith.cmpf ogt, %136, %137 : vector<8x128xf32>
    %cst_60 = arith.constant 2.000000e-01 : f32
    %139 = vector.broadcast %cst_60 : f32 to vector<8x128xf32>
    %140 = arith.mulf %136, %139 : vector<8x128xf32>
    %141 = arith.select %138, %136, %140 : vector<8x128xi1>, vector<8x128xf32>
    %142 = vector.extract_strided_slice %4 {offsets = [0, 5], sizes = [8, 1], strides = [1, 1]} : vector<8x8xf32> to vector<8x1xf32>
    %143 = vector.broadcast %142 : vector<8x1xf32> to vector<8x128xf32>
    %144 = arith.subf %141, %143 : vector<8x128xf32>
    %145 = math.exp %144 : vector<8x128xf32>
    %c0_61 = arith.constant 0 : index
    %c5 = arith.constant 5 : index
    %146 = vector.load %arg8[%c0_61, %c5] : memref<8x8xf32, #tpu.memory_space<vmem>>, vector<8x1xf32>
    %cst_62 = arith.constant dense<0.000000e+00> : vector<8xf32>
    %147 = vector.multi_reduction <add>, %145, %cst_62 [1] : vector<8x128xf32> to vector<8xf32>
    %148 = vector.shape_cast %147 : vector<8xf32> to vector<8x1xf32>
    %149 = arith.addf %146, %148 : vector<8x1xf32>
    %c0_63 = arith.constant 0 : index
    %c5_64 = arith.constant 5 : index
    %150 = vector.load %arg8[%c0_63, %c5_64] : memref<8x8xf32, #tpu.memory_space<vmem>>, vector<8x1xf32>
    tpu.vector_store %arg8[%c0_63, %c5_64], %149 {strides = array<i32>} : memref<8x8xf32, #tpu.memory_space<vmem>>, vector<8x1xf32>,
    %c0_65 = arith.constant 0 : index
    %c40 = arith.constant 40 : index
    %151 = vector.load %arg7[%c0_65, %c40] : memref<8x64xf32, #tpu.memory_space<vmem>>, vector<8x8xf32>
    %152 = arith.truncf %145 : vector<8x128xf32> to vector<8x128xbf16>
    %153 = vector.extract_strided_slice %6 {offsets = [0, 40], sizes = [128, 8], strides = [1, 1]} : vector<128x64xbf16> to vector<128x8xbf16>
    %cst_66 = arith.constant dense<0.000000e+00> : vector<8x8xf32>
    %154 = tpu.matmul %152, %153, %cst_66 {dimension_numbers = #tpu.dot_dimension_numbers<[1], [0], [0], [1], [0, 0, 1, 1], [], []>} : vector<8x128xbf16>, vector<128x8xbf16>, vector<8x8xf32> -> vector<8x8xf32>
    %155 = arith.addf %151, %154 : vector<8x8xf32>
    %c0_67 = arith.constant 0 : index
    %c40_68 = arith.constant 40 : index
    %156 = vector.load %arg7[%c0_67, %c40_68] : memref<8x64xf32, #tpu.memory_space<vmem>>, vector<8x8xf32>
    tpu.vector_store %arg7[%c0_67, %c40_68], %155 {strides = array<i32>} : memref<8x64xf32, #tpu.memory_space<vmem>>, vector<8x8xf32>,
    %157 = vector.extract_strided_slice %3 {offsets = [0, 6], sizes = [8, 1], strides = [1, 1]} : vector<8x8xf32> to vector<8x1xf32>
    %158 = vector.extract_strided_slice %5 {offsets = [6, 0], sizes = [1, 128], strides = [1, 1]} : vector<8x128xf32> to vector<1x128xf32>
    %159 = vector.broadcast %157 : vector<8x1xf32> to vector<8x128xf32>
    %160 = vector.broadcast %158 : vector<1x128xf32> to vector<8x128xf32>
    %161 = arith.addf %159, %160 : vector<8x128xf32>
    %cst_69 = arith.constant 0.000000e+00 : f32
    %162 = vector.broadcast %cst_69 : f32 to vector<8x128xf32>
    %163 = arith.cmpf ogt, %161, %162 : vector<8x128xf32>
    %cst_70 = arith.constant 2.000000e-01 : f32
    %164 = vector.broadcast %cst_70 : f32 to vector<8x128xf32>
    %165 = arith.mulf %161, %164 : vector<8x128xf32>
    %166 = arith.select %163, %161, %165 : vector<8x128xi1>, vector<8x128xf32>
    %167 = vector.extract_strided_slice %4 {offsets = [0, 6], sizes = [8, 1], strides = [1, 1]} : vector<8x8xf32> to vector<8x1xf32>
    %168 = vector.broadcast %167 : vector<8x1xf32> to vector<8x128xf32>
    %169 = arith.subf %166, %168 : vector<8x128xf32>
    %170 = math.exp %169 : vector<8x128xf32>
    %c0_71 = arith.constant 0 : index
    %c6 = arith.constant 6 : index
    %171 = vector.load %arg8[%c0_71, %c6] : memref<8x8xf32, #tpu.memory_space<vmem>>, vector<8x1xf32>
    %cst_72 = arith.constant dense<0.000000e+00> : vector<8xf32>
    %172 = vector.multi_reduction <add>, %170, %cst_72 [1] : vector<8x128xf32> to vector<8xf32>
    %173 = vector.shape_cast %172 : vector<8xf32> to vector<8x1xf32>
    %174 = arith.addf %171, %173 : vector<8x1xf32>
    %c0_73 = arith.constant 0 : index
    %c6_74 = arith.constant 6 : index
    %175 = vector.load %arg8[%c0_73, %c6_74] : memref<8x8xf32, #tpu.memory_space<vmem>>, vector<8x1xf32>
    tpu.vector_store %arg8[%c0_73, %c6_74], %174 {strides = array<i32>} : memref<8x8xf32, #tpu.memory_space<vmem>>, vector<8x1xf32>,
    %c0_75 = arith.constant 0 : index
    %c48 = arith.constant 48 : index
    %176 = vector.load %arg7[%c0_75, %c48] : memref<8x64xf32, #tpu.memory_space<vmem>>, vector<8x8xf32>
    %177 = arith.truncf %170 : vector<8x128xf32> to vector<8x128xbf16>
    %178 = vector.extract_strided_slice %6 {offsets = [0, 48], sizes = [128, 8], strides = [1, 1]} : vector<128x64xbf16> to vector<128x8xbf16>
    %cst_76 = arith.constant dense<0.000000e+00> : vector<8x8xf32>
    %179 = tpu.matmul %177, %178, %cst_76 {dimension_numbers = #tpu.dot_dimension_numbers<[1], [0], [0], [1], [0, 0, 1, 1], [], []>} : vector<8x128xbf16>, vector<128x8xbf16>, vector<8x8xf32> -> vector<8x8xf32>
    %180 = arith.addf %176, %179 : vector<8x8xf32>
    %c0_77 = arith.constant 0 : index
    %c48_78 = arith.constant 48 : index
    %181 = vector.load %arg7[%c0_77, %c48_78] : memref<8x64xf32, #tpu.memory_space<vmem>>, vector<8x8xf32>
    tpu.vector_store %arg7[%c0_77, %c48_78], %180 {strides = array<i32>} : memref<8x64xf32, #tpu.memory_space<vmem>>, vector<8x8xf32>,
    %182 = vector.extract_strided_slice %3 {offsets = [0, 7], sizes = [8, 1], strides = [1, 1]} : vector<8x8xf32> to vector<8x1xf32>
    %183 = vector.extract_strided_slice %5 {offsets = [7, 0], sizes = [1, 128], strides = [1, 1]} : vector<8x128xf32> to vector<1x128xf32>
    %184 = vector.broadcast %182 : vector<8x1xf32> to vector<8x128xf32>
    %185 = vector.broadcast %183 : vector<1x128xf32> to vector<8x128xf32>
    %186 = arith.addf %184, %185 : vector<8x128xf32>
    %cst_79 = arith.constant 0.000000e+00 : f32
    %187 = vector.broadcast %cst_79 : f32 to vector<8x128xf32>
    %188 = arith.cmpf ogt, %186, %187 : vector<8x128xf32>
    %cst_80 = arith.constant 2.000000e-01 : f32
    %189 = vector.broadcast %cst_80 : f32 to vector<8x128xf32>
    %190 = arith.mulf %186, %189 : vector<8x128xf32>
    %191 = arith.select %188, %186, %190 : vector<8x128xi1>, vector<8x128xf32>
    %192 = vector.extract_strided_slice %4 {offsets = [0, 7], sizes = [8, 1], strides = [1, 1]} : vector<8x8xf32> to vector<8x1xf32>
    %193 = vector.broadcast %192 : vector<8x1xf32> to vector<8x128xf32>
    %194 = arith.subf %191, %193 : vector<8x128xf32>
    %195 = math.exp %194 : vector<8x128xf32>
    %c0_81 = arith.constant 0 : index
    %c7 = arith.constant 7 : index
    %196 = vector.load %arg8[%c0_81, %c7] : memref<8x8xf32, #tpu.memory_space<vmem>>, vector<8x1xf32>
    %cst_82 = arith.constant dense<0.000000e+00> : vector<8xf32>
    %197 = vector.multi_reduction <add>, %195, %cst_82 [1] : vector<8x128xf32> to vector<8xf32>
    %198 = vector.shape_cast %197 : vector<8xf32> to vector<8x1xf32>
    %199 = arith.addf %196, %198 : vector<8x1xf32>
    %c0_83 = arith.constant 0 : index
    %c7_84 = arith.constant 7 : index
    %200 = vector.load %arg8[%c0_83, %c7_84] : memref<8x8xf32, #tpu.memory_space<vmem>>, vector<8x1xf32>
    tpu.vector_store %arg8[%c0_83, %c7_84], %199 {strides = array<i32>} : memref<8x8xf32, #tpu.memory_space<vmem>>, vector<8x1xf32>,
    %c0_85 = arith.constant 0 : index
    %c56 = arith.constant 56 : index
    %201 = vector.load %arg7[%c0_85, %c56] : memref<8x64xf32, #tpu.memory_space<vmem>>, vector<8x8xf32>
    %202 = arith.truncf %195 : vector<8x128xf32> to vector<8x128xbf16>
    %203 = vector.extract_strided_slice %6 {offsets = [0, 56], sizes = [128, 8], strides = [1, 1]} : vector<128x64xbf16> to vector<128x8xbf16>
    %cst_86 = arith.constant dense<0.000000e+00> : vector<8x8xf32>
    %204 = tpu.matmul %202, %203, %cst_86 {dimension_numbers = #tpu.dot_dimension_numbers<[1], [0], [0], [1], [0, 0, 1, 1], [], []>} : vector<8x128xbf16>, vector<128x8xbf16>, vector<8x8xf32> -> vector<8x8xf32>
    %205 = arith.addf %201, %204 : vector<8x8xf32>
    %c0_87 = arith.constant 0 : index
    %c56_88 = arith.constant 56 : index
    %206 = vector.load %arg7[%c0_87, %c56_88] : memref<8x64xf32, #tpu.memory_space<vmem>>, vector<8x8xf32>
    tpu.vector_store %arg7[%c0_87, %c56_88], %205 {strides = array<i32>} : memref<8x64xf32, #tpu.memory_space<vmem>>, vector<8x8xf32>,
    %c0_i32_89 = arith.constant 0 : i32
    %207 = arith.cmpi eq, %arg1, %c0_i32_89 : i32
    %208 = arith.extui %207 : i1 to i32
    %c0_i32_90 = arith.constant 0 : i32
    %209 = arith.cmpi ne, %208, %c0_i32_90 : i32
    scf.if %209 {
      %c0_91 = arith.constant 0 : index
      %c0_92 = arith.constant 0 : index
      %210 = vector.load %arg7[%c0_91, %c0_92] : memref<8x64xf32, #tpu.memory_space<vmem>>, vector<8x64xf32>
      %c0_93 = arith.constant 0 : index
      %c0_94 = arith.constant 0 : index
      %211 = vector.load %arg8[%c0_93, %c0_94] : memref<8x8xf32, #tpu.memory_space<vmem>>, vector<8x8xf32>
      %212 = tpu.reciprocal %211 {approx = true} : vector<8x8xf32> -> vector<8x8xf32>
      %213 = vector.extract_strided_slice %210 {offsets = [0, 0], sizes = [8, 8], strides = [1, 1]} : vector<8x64xf32> to vector<8x8xf32>
      %214 = vector.extract_strided_slice %212 {offsets = [0, 0], sizes = [8, 1], strides = [1, 1]} : vector<8x8xf32> to vector<8x1xf32>
      %215 = vector.broadcast %214 : vector<8x1xf32> to vector<8x8xf32>
      %216 = arith.mulf %213, %215 : vector<8x8xf32>
      %cst_95 = arith.constant 0.000000e+00 : f32
      %217 = vector.broadcast %cst_95 : f32 to vector<8x8xf32>
      %218 = arith.cmpf ogt, %216, %217 : vector<8x8xf32>
      %cst_96 = arith.constant 0.000000e+00 : f32
      %219 = vector.broadcast %cst_96 : f32 to vector<8x8xf32>
      %220 = arith.minimumf %216, %219 : vector<8x8xf32>
      %221 = math.exp %220 : vector<8x8xf32>
      %cst_97 = arith.constant 1.000000e+00 : f32
      %222 = vector.broadcast %cst_97 : f32 to vector<8x8xf32>
      %223 = arith.subf %221, %222 : vector<8x8xf32>
      %224 = arith.select %218, %216, %223 : vector<8x8xi1>, vector<8x8xf32>
      %225 = vector.extract_strided_slice %210 {offsets = [0, 8], sizes = [8, 8], strides = [1, 1]} : vector<8x64xf32> to vector<8x8xf32>
      %226 = vector.extract_strided_slice %212 {offsets = [0, 1], sizes = [8, 1], strides = [1, 1]} : vector<8x8xf32> to vector<8x1xf32>
      %227 = vector.broadcast %226 : vector<8x1xf32> to vector<8x8xf32>
      %228 = arith.mulf %225, %227 : vector<8x8xf32>
      %cst_98 = arith.constant 0.000000e+00 : f32
      %229 = vector.broadcast %cst_98 : f32 to vector<8x8xf32>
      %230 = arith.cmpf ogt, %228, %229 : vector<8x8xf32>
      %cst_99 = arith.constant 0.000000e+00 : f32
      %231 = vector.broadcast %cst_99 : f32 to vector<8x8xf32>
      %232 = arith.minimumf %228, %231 : vector<8x8xf32>
      %233 = math.exp %232 : vector<8x8xf32>
      %cst_100 = arith.constant 1.000000e+00 : f32
      %234 = vector.broadcast %cst_100 : f32 to vector<8x8xf32>
      %235 = arith.subf %233, %234 : vector<8x8xf32>
      %236 = arith.select %230, %228, %235 : vector<8x8xi1>, vector<8x8xf32>
      %237 = vector.extract_strided_slice %210 {offsets = [0, 16], sizes = [8, 8], strides = [1, 1]} : vector<8x64xf32> to vector<8x8xf32>
      %238 = vector.extract_strided_slice %212 {offsets = [0, 2], sizes = [8, 1], strides = [1, 1]} : vector<8x8xf32> to vector<8x1xf32>
      %239 = vector.broadcast %238 : vector<8x1xf32> to vector<8x8xf32>
      %240 = arith.mulf %237, %239 : vector<8x8xf32>
      %cst_101 = arith.constant 0.000000e+00 : f32
      %241 = vector.broadcast %cst_101 : f32 to vector<8x8xf32>
      %242 = arith.cmpf ogt, %240, %241 : vector<8x8xf32>
      %cst_102 = arith.constant 0.000000e+00 : f32
      %243 = vector.broadcast %cst_102 : f32 to vector<8x8xf32>
      %244 = arith.minimumf %240, %243 : vector<8x8xf32>
      %245 = math.exp %244 : vector<8x8xf32>
      %cst_103 = arith.constant 1.000000e+00 : f32
      %246 = vector.broadcast %cst_103 : f32 to vector<8x8xf32>
      %247 = arith.subf %245, %246 : vector<8x8xf32>
      %248 = arith.select %242, %240, %247 : vector<8x8xi1>, vector<8x8xf32>
      %249 = vector.extract_strided_slice %210 {offsets = [0, 24], sizes = [8, 8], strides = [1, 1]} : vector<8x64xf32> to vector<8x8xf32>
      %250 = vector.extract_strided_slice %212 {offsets = [0, 3], sizes = [8, 1], strides = [1, 1]} : vector<8x8xf32> to vector<8x1xf32>
      %251 = vector.broadcast %250 : vector<8x1xf32> to vector<8x8xf32>
      %252 = arith.mulf %249, %251 : vector<8x8xf32>
      %cst_104 = arith.constant 0.000000e+00 : f32
      %253 = vector.broadcast %cst_104 : f32 to vector<8x8xf32>
      %254 = arith.cmpf ogt, %252, %253 : vector<8x8xf32>
      %cst_105 = arith.constant 0.000000e+00 : f32
      %255 = vector.broadcast %cst_105 : f32 to vector<8x8xf32>
      %256 = arith.minimumf %252, %255 : vector<8x8xf32>
      %257 = math.exp %256 : vector<8x8xf32>
      %cst_106 = arith.constant 1.000000e+00 : f32
      %258 = vector.broadcast %cst_106 : f32 to vector<8x8xf32>
      %259 = arith.subf %257, %258 : vector<8x8xf32>
      %260 = arith.select %254, %252, %259 : vector<8x8xi1>, vector<8x8xf32>
      %261 = vector.extract_strided_slice %210 {offsets = [0, 32], sizes = [8, 8], strides = [1, 1]} : vector<8x64xf32> to vector<8x8xf32>
      %262 = vector.extract_strided_slice %212 {offsets = [0, 4], sizes = [8, 1], strides = [1, 1]} : vector<8x8xf32> to vector<8x1xf32>
      %263 = vector.broadcast %262 : vector<8x1xf32> to vector<8x8xf32>
      %264 = arith.mulf %261, %263 : vector<8x8xf32>
      %cst_107 = arith.constant 0.000000e+00 : f32
      %265 = vector.broadcast %cst_107 : f32 to vector<8x8xf32>
      %266 = arith.cmpf ogt, %264, %265 : vector<8x8xf32>
      %cst_108 = arith.constant 0.000000e+00 : f32
      %267 = vector.broadcast %cst_108 : f32 to vector<8x8xf32>
      %268 = arith.minimumf %264, %267 : vector<8x8xf32>
      %269 = math.exp %268 : vector<8x8xf32>
      %cst_109 = arith.constant 1.000000e+00 : f32
      %270 = vector.broadcast %cst_109 : f32 to vector<8x8xf32>
      %271 = arith.subf %269, %270 : vector<8x8xf32>
      %272 = arith.select %266, %264, %271 : vector<8x8xi1>, vector<8x8xf32>
      %273 = vector.extract_strided_slice %210 {offsets = [0, 40], sizes = [8, 8], strides = [1, 1]} : vector<8x64xf32> to vector<8x8xf32>
      %274 = vector.extract_strided_slice %212 {offsets = [0, 5], sizes = [8, 1], strides = [1, 1]} : vector<8x8xf32> to vector<8x1xf32>
      %275 = vector.broadcast %274 : vector<8x1xf32> to vector<8x8xf32>
      %276 = arith.mulf %273, %275 : vector<8x8xf32>
      %cst_110 = arith.constant 0.000000e+00 : f32
      %277 = vector.broadcast %cst_110 : f32 to vector<8x8xf32>
      %278 = arith.cmpf ogt, %276, %277 : vector<8x8xf32>
      %cst_111 = arith.constant 0.000000e+00 : f32
      %279 = vector.broadcast %cst_111 : f32 to vector<8x8xf32>
      %280 = arith.minimumf %276, %279 : vector<8x8xf32>
      %281 = math.exp %280 : vector<8x8xf32>
      %cst_112 = arith.constant 1.000000e+00 : f32
      %282 = vector.broadcast %cst_112 : f32 to vector<8x8xf32>
      %283 = arith.subf %281, %282 : vector<8x8xf32>
      %284 = arith.select %278, %276, %283 : vector<8x8xi1>, vector<8x8xf32>
      %285 = vector.extract_strided_slice %210 {offsets = [0, 48], sizes = [8, 8], strides = [1, 1]} : vector<8x64xf32> to vector<8x8xf32>
      %286 = vector.extract_strided_slice %212 {offsets = [0, 6], sizes = [8, 1], strides = [1, 1]} : vector<8x8xf32> to vector<8x1xf32>
      %287 = vector.broadcast %286 : vector<8x1xf32> to vector<8x8xf32>
      %288 = arith.mulf %285, %287 : vector<8x8xf32>
      %cst_113 = arith.constant 0.000000e+00 : f32
      %289 = vector.broadcast %cst_113 : f32 to vector<8x8xf32>
      %290 = arith.cmpf ogt, %288, %289 : vector<8x8xf32>
      %cst_114 = arith.constant 0.000000e+00 : f32
      %291 = vector.broadcast %cst_114 : f32 to vector<8x8xf32>
      %292 = arith.minimumf %288, %291 : vector<8x8xf32>
      %293 = math.exp %292 : vector<8x8xf32>
      %cst_115 = arith.constant 1.000000e+00 : f32
      %294 = vector.broadcast %cst_115 : f32 to vector<8x8xf32>
      %295 = arith.subf %293, %294 : vector<8x8xf32>
      %296 = arith.select %290, %288, %295 : vector<8x8xi1>, vector<8x8xf32>
      %297 = vector.extract_strided_slice %210 {offsets = [0, 56], sizes = [8, 8], strides = [1, 1]} : vector<8x64xf32> to vector<8x8xf32>
      %298 = vector.extract_strided_slice %212 {offsets = [0, 7], sizes = [8, 1], strides = [1, 1]} : vector<8x8xf32> to vector<8x1xf32>
      %299 = vector.broadcast %298 : vector<8x1xf32> to vector<8x8xf32>
      %300 = arith.mulf %297, %299 : vector<8x8xf32>
      %cst_116 = arith.constant 0.000000e+00 : f32
      %301 = vector.broadcast %cst_116 : f32 to vector<8x8xf32>
      %302 = arith.cmpf ogt, %300, %301 : vector<8x8xf32>
      %cst_117 = arith.constant 0.000000e+00 : f32
      %303 = vector.broadcast %cst_117 : f32 to vector<8x8xf32>
      %304 = arith.minimumf %300, %303 : vector<8x8xf32>
      %305 = math.exp %304 : vector<8x8xf32>
      %cst_118 = arith.constant 1.000000e+00 : f32
      %306 = vector.broadcast %cst_118 : f32 to vector<8x8xf32>
      %307 = arith.subf %305, %306 : vector<8x8xf32>
      %308 = arith.select %302, %300, %307 : vector<8x8xi1>, vector<8x8xf32>
      %309 = tpu.concatenate %224, %236, %248, %260, %272, %284, %296, %308 in 1 : vector<8x8xf32>, vector<8x8xf32>, vector<8x8xf32>, vector<8x8xf32>, vector<8x8xf32>, vector<8x8xf32>, vector<8x8xf32>, vector<8x8xf32> -> vector<8x64xf32>
      %cst_119 = arith.constant 0.000000e+00 : f32
      %310 = vector.broadcast %cst_119 : f32 to vector<8x64xf32>
      %311 = tpu.concatenate %309, %310 in 1 : vector<8x64xf32>, vector<8x64xf32> -> vector<8x128xf32>
      %c0_120 = arith.constant 0 : index
      %c0_121 = arith.constant 0 : index
      %312 = vector.load %arg6[%c0_120, %c0_121] : memref<8x128xf32, #tpu.memory_space<vmem>>, vector<8x128xf32>
      tpu.vector_store %arg6[%c0_120, %c0_121], %311 {strides = array<i32>} : memref<8x128xf32, #tpu.memory_space<vmem>>, vector<8x128xf32>,
    } else {
    }
    return
  }
  func.func @transform_0(%arg0: i32, %arg1: i32) -> (i32, i32) {
    %c0_i32 = arith.constant 0 : i32
    %c0_i32_0 = arith.constant 0 : i32
    return %arg0, %c0_i32 : i32, i32
  }
  func.func @transform_1(%arg0: i32, %arg1: i32) -> (i32, i32) {
    %c0_i32 = arith.constant 0 : i32
    %c0_i32_0 = arith.constant 0 : i32
    return %arg0, %c0_i32 : i32, i32
  }
  func.func @transform_2(%arg0: i32, %arg1: i32) -> (i32, i32) {
    %c0_i32 = arith.constant 0 : i32
    %c0_i32_0 = arith.constant 0 : i32
    return %c0_i32, %arg1 : i32, i32
  }
  func.func @transform_3(%arg0: i32, %arg1: i32) -> (i32, i32) {
    %c0_i32 = arith.constant 0 : i32
    %c0_i32_0 = arith.constant 0 : i32
    return %arg1, %c0_i32 : i32, i32
  }
  func.func @transform_4(%arg0: i32, %arg1: i32) -> (i32, i32) {
    %c0_i32 = arith.constant 0 : i32
    %c0_i32_0 = arith.constant 0 : i32
    return %arg0, %c0_i32 : i32, i32
  }
}

module attributes {stable_mosaic.version = 11 : i64} {
  func.func @_gat_attention_kernel(%arg0: i32, %arg1: i32, %arg2: memref<8x1xf32, #tpu.memory_space<vmem>>, %arg3: memref<8x1xf32, #tpu.memory_space<vmem>>, %arg4: memref<1x128xf32, #tpu.memory_space<vmem>>, %arg5: memref<128x4xbf16, #tpu.memory_space<vmem>>, %arg6: memref<8x128xf32, #tpu.memory_space<vmem>>, %arg7: memref<8x4xf32, #tpu.memory_space<vmem>>, %arg8: memref<8x1xf32, #tpu.memory_space<vmem>>) attributes {dimension_semantics = [#tpu.dimension_semantics<parallel>, #tpu.dimension_semantics<arbitrary>], iteration_bounds = array<i64: 2, 1>, scalar_prefetch = 0 : i64, scratch_operands = 2 : i64, tpu.core_type = #tpu.core_type<tc>, window_params = [{transform_indices = @transform_0, window_bounds = array<i64: 8, 1>}, {transform_indices = @transform_1, window_bounds = array<i64: 8, 1>}, {transform_indices = @transform_2, window_bounds = array<i64: 1, 128>}, {transform_indices = @transform_3, window_bounds = array<i64: 128, 4>}, {transform_indices = @transform_4, window_bounds = array<i64: 8, 128>}]} {
    %c0_i32 = arith.constant 0 : i32
    %0 = arith.cmpi eq, %arg1, %c0_i32 : i32
    %1 = arith.extui %0 : i1 to i32
    %c0_i32_0 = arith.constant 0 : i32
    %2 = arith.cmpi ne, %1, %c0_i32_0 : i32
    scf.if %2 {
      %cst_21 = arith.constant 0.000000e+00 : f32
      %31 = vector.broadcast %cst_21 : f32 to vector<8x4xf32>
      %c0_22 = arith.constant 0 : index
      %c0_23 = arith.constant 0 : index
      %32 = vector.load %arg7[%c0_22, %c0_23] : memref<8x4xf32, #tpu.memory_space<vmem>>, vector<8x4xf32>
      tpu.vector_store %arg7[%c0_22, %c0_23], %31 {strides = array<i32>} : memref<8x4xf32, #tpu.memory_space<vmem>>, vector<8x4xf32>,
      %cst_24 = arith.constant 0.000000e+00 : f32
      %33 = vector.broadcast %cst_24 : f32 to vector<8x1xf32>
      %c0_25 = arith.constant 0 : index
      %c0_26 = arith.constant 0 : index
      %34 = vector.load %arg8[%c0_25, %c0_26] : memref<8x1xf32, #tpu.memory_space<vmem>>, vector<8x1xf32>
      tpu.vector_store %arg8[%c0_25, %c0_26], %33 {strides = array<i32>} : memref<8x1xf32, #tpu.memory_space<vmem>>, vector<8x1xf32>,
    } else {
    }
    %c0 = arith.constant 0 : index
    %c0_1 = arith.constant 0 : index
    %3 = vector.load %arg2[%c0, %c0_1] : memref<8x1xf32, #tpu.memory_space<vmem>>, vector<8x1xf32>
    %c0_2 = arith.constant 0 : index
    %c0_3 = arith.constant 0 : index
    %4 = vector.load %arg3[%c0_2, %c0_3] : memref<8x1xf32, #tpu.memory_space<vmem>>, vector<8x1xf32>
    %c0_4 = arith.constant 0 : index
    %c0_5 = arith.constant 0 : index
    %5 = vector.load %arg4[%c0_4, %c0_5] : memref<1x128xf32, #tpu.memory_space<vmem>>, vector<1x128xf32>
    %c0_6 = arith.constant 0 : index
    %c0_7 = arith.constant 0 : index
    %6 = vector.load %arg5[%c0_6, %c0_7] : memref<128x4xbf16, #tpu.memory_space<vmem>>, vector<128x4xbf16>
    %7 = vector.broadcast %3 : vector<8x1xf32> to vector<8x128xf32>
    %8 = vector.broadcast %5 : vector<1x128xf32> to vector<8x128xf32>
    %9 = arith.addf %7, %8 : vector<8x128xf32>
    %cst = arith.constant 0.000000e+00 : f32
    %10 = vector.broadcast %cst : f32 to vector<8x128xf32>
    %11 = arith.cmpf ogt, %9, %10 : vector<8x128xf32>
    %cst_8 = arith.constant 2.000000e-01 : f32
    %12 = vector.broadcast %cst_8 : f32 to vector<8x128xf32>
    %13 = arith.mulf %9, %12 : vector<8x128xf32>
    %14 = arith.select %11, %9, %13 : vector<8x128xi1>, vector<8x128xf32>
    %15 = vector.broadcast %4 : vector<8x1xf32> to vector<8x128xf32>
    %16 = arith.subf %14, %15 : vector<8x128xf32>
    %17 = math.exp %16 : vector<8x128xf32>
    %c0_9 = arith.constant 0 : index
    %c0_10 = arith.constant 0 : index
    %18 = vector.load %arg8[%c0_9, %c0_10] : memref<8x1xf32, #tpu.memory_space<vmem>>, vector<8x1xf32>
    %cst_11 = arith.constant dense<0.000000e+00> : vector<8xf32>
    %19 = vector.multi_reduction <add>, %17, %cst_11 [1] : vector<8x128xf32> to vector<8xf32>
    %20 = vector.shape_cast %19 : vector<8xf32> to vector<8x1xf32>
    %21 = arith.addf %18, %20 : vector<8x1xf32>
    %c0_12 = arith.constant 0 : index
    %c0_13 = arith.constant 0 : index
    %22 = vector.load %arg8[%c0_12, %c0_13] : memref<8x1xf32, #tpu.memory_space<vmem>>, vector<8x1xf32>
    tpu.vector_store %arg8[%c0_12, %c0_13], %21 {strides = array<i32>} : memref<8x1xf32, #tpu.memory_space<vmem>>, vector<8x1xf32>,
    %c0_14 = arith.constant 0 : index
    %c0_15 = arith.constant 0 : index
    %23 = vector.load %arg7[%c0_14, %c0_15] : memref<8x4xf32, #tpu.memory_space<vmem>>, vector<8x4xf32>
    %24 = arith.truncf %17 : vector<8x128xf32> to vector<8x128xbf16>
    %cst_16 = arith.constant dense<0.000000e+00> : vector<8x4xf32>
    %25 = tpu.matmul %24, %6, %cst_16 {dimension_numbers = #tpu.dot_dimension_numbers<[1], [0], [0], [1], [0, 0, 1, 1], [], []>} : vector<8x128xbf16>, vector<128x4xbf16>, vector<8x4xf32> -> vector<8x4xf32>
    %26 = arith.addf %23, %25 : vector<8x4xf32>
    %c0_17 = arith.constant 0 : index
    %c0_18 = arith.constant 0 : index
    %27 = vector.load %arg7[%c0_17, %c0_18] : memref<8x4xf32, #tpu.memory_space<vmem>>, vector<8x4xf32>
    tpu.vector_store %arg7[%c0_17, %c0_18], %26 {strides = array<i32>} : memref<8x4xf32, #tpu.memory_space<vmem>>, vector<8x4xf32>,
    %c0_i32_19 = arith.constant 0 : i32
    %28 = arith.cmpi eq, %arg1, %c0_i32_19 : i32
    %29 = arith.extui %28 : i1 to i32
    %c0_i32_20 = arith.constant 0 : i32
    %30 = arith.cmpi ne, %29, %c0_i32_20 : i32
    scf.if %30 {
      %c0_21 = arith.constant 0 : index
      %c0_22 = arith.constant 0 : index
      %31 = vector.load %arg7[%c0_21, %c0_22] : memref<8x4xf32, #tpu.memory_space<vmem>>, vector<8x4xf32>
      %c0_23 = arith.constant 0 : index
      %c0_24 = arith.constant 0 : index
      %32 = vector.load %arg8[%c0_23, %c0_24] : memref<8x1xf32, #tpu.memory_space<vmem>>, vector<8x1xf32>
      %33 = tpu.reciprocal %32 {approx = true} : vector<8x1xf32> -> vector<8x1xf32>
      %34 = vector.broadcast %33 : vector<8x1xf32> to vector<8x4xf32>
      %35 = arith.mulf %31, %34 : vector<8x4xf32>
      %cst_25 = arith.constant 0.000000e+00 : f32
      %36 = vector.broadcast %cst_25 : f32 to vector<8x4xf32>
      %37 = arith.cmpf ogt, %35, %36 : vector<8x4xf32>
      %cst_26 = arith.constant 0.000000e+00 : f32
      %38 = vector.broadcast %cst_26 : f32 to vector<8x4xf32>
      %39 = arith.minimumf %35, %38 : vector<8x4xf32>
      %40 = math.exp %39 : vector<8x4xf32>
      %cst_27 = arith.constant 1.000000e+00 : f32
      %41 = vector.broadcast %cst_27 : f32 to vector<8x4xf32>
      %42 = arith.subf %40, %41 : vector<8x4xf32>
      %43 = arith.select %37, %35, %42 : vector<8x4xi1>, vector<8x4xf32>
      %cst_28 = arith.constant dense<0xFF800000> : vector<8xf32>
      %44 = vector.multi_reduction <maximumf>, %43, %cst_28 [1] : vector<8x4xf32> to vector<8xf32>
      %45 = vector.shape_cast %44 : vector<8xf32> to vector<8x1xf32>
      %46 = vector.broadcast %45 : vector<8x1xf32> to vector<8x4xf32>
      %47 = arith.subf %43, %46 : vector<8x4xf32>
      %48 = math.exp %47 : vector<8x4xf32>
      %cst_29 = arith.constant dense<0.000000e+00> : vector<8xf32>
      %49 = vector.multi_reduction <add>, %48, %cst_29 [1] : vector<8x4xf32> to vector<8xf32>
      %50 = vector.shape_cast %49 : vector<8xf32> to vector<8x1xf32>
      %51 = math.log %50 : vector<8x1xf32>
      %52 = arith.addf %51, %45 : vector<8x1xf32>
      %53 = vector.broadcast %52 : vector<8x1xf32> to vector<8x4xf32>
      %54 = arith.subf %43, %53 : vector<8x4xf32>
      %cst_30 = arith.constant 0.000000e+00 : f32
      %55 = vector.broadcast %cst_30 : f32 to vector<8x124xf32>
      %56 = tpu.concatenate %54, %55 in 1 : vector<8x4xf32>, vector<8x124xf32> -> vector<8x128xf32>
      %c0_31 = arith.constant 0 : index
      %c0_32 = arith.constant 0 : index
      %57 = vector.load %arg6[%c0_31, %c0_32] : memref<8x128xf32, #tpu.memory_space<vmem>>, vector<8x128xf32>
      tpu.vector_store %arg6[%c0_31, %c0_32], %56 {strides = array<i32>} : memref<8x128xf32, #tpu.memory_space<vmem>>, vector<8x128xf32>,
    } else {
    }
    return
  }
  func.func @transform_0(%arg0: i32, %arg1: i32) -> (i32, i32) {
    %c0_i32 = arith.constant 0 : i32
    %c0_i32_0 = arith.constant 0 : i32
    return %arg0, %c0_i32 : i32, i32
  }
  func.func @transform_1(%arg0: i32, %arg1: i32) -> (i32, i32) {
    %c0_i32 = arith.constant 0 : i32
    %c0_i32_0 = arith.constant 0 : i32
    return %arg0, %c0_i32 : i32, i32
  }
  func.func @transform_2(%arg0: i32, %arg1: i32) -> (i32, i32) {
    %c0_i32 = arith.constant 0 : i32
    %c0_i32_0 = arith.constant 0 : i32
    return %c0_i32, %arg1 : i32, i32
  }
  func.func @transform_3(%arg0: i32, %arg1: i32) -> (i32, i32) {
    %c0_i32 = arith.constant 0 : i32
    %c0_i32_0 = arith.constant 0 : i32
    return %arg1, %c0_i32 : i32, i32
  }
  func.func @transform_4(%arg0: i32, %arg1: i32) -> (i32, i32) {
    %c0_i32 = arith.constant 0 : i32
    %c0_i32_0 = arith.constant 0 : i32
    return %arg0, %c0_i32 : i32, i32
  }
}

</mosaic_0001>

<bundles_post_ra>
// kernel: spatial_gat_forward.3
= control target key start
LH: loop header
LB: loop body
LE: loop exit
PB: predicated region body
PF: predicated region fallthrough
CT: control target
= control target key end

     0   :  { %s692_s15 = smov 0   ;;  %s694_s16 = smov 0   ;;  %s767_s0 = inlined_call_operand.vmem [shape: f32[16,1], index: 0, kind: input, shape index: {}]   ;;  %s768_s1 = inlined_call_operand.vmem [shape: f32[16,1], index: 1, kind: input, shape index: {}]   ;;  %s769_s2 = inlined_call_operand.vmem [shape: f32[1,128], index: 2, kind: input, shape index: {}]   ;;  %s770_s3 = inlined_call_operand.vmem [shape: bf16[128,4], index: 3, kind: input, shape index: {}]   ;;  %s771_s4 = inlined_call_operand.vmem [shape: f32[16,128], index: 4, kind: output, shape index: {}]  }
   0x1   :  { %s696_s17 = smov 0  }
   0x2 LB: > { %s26_s18 = sadd.s32 1, %s658_s16  ;;  %p548_p0 = scmp.ge.s32.totalorder %s662_s17, 1  ;;  %s662_s17 = sphi %s696_s17, %s14_s17   ;;  %s658_s16 = sphi %s694_s16, %s773_s16   ;;  %s654_s15 = sphi %s692_s15, %s772_s15  }
   0x3   : > { %p28_p1 = scmp.ge.s32.totalorder %s26_s18, 2  ;;  %p201_p2 = scmp.lt.s32.totalorder %s662_s17, 3 }
   0x5   : > { %s775_s18 = smov (%p28_p1, %s26_s18), 0  ;;  %p202_p3 = pnand %p548_p0, %p201_p2 }
   0x6   : > { %p237_p4 = scmp.lt.s32.totalorder (!%p202_p3), %s654_s15, 1 }
   0x7   : > { %205 = sbr.rel (%p202_p3) target bundleno = 790 (0x316), region = 36 }
   0xc   : > { %v622_v0 = vld [vmem:[%s770_s3 + $0x38] sm:$0xff]   ;;  %v664_v1 = vmov 0   ;;  %v665_v2 = vmov 0.0   ;;  %s777_s15 = smov (!%p237_p4, %s654_s15), 1  ;;  %v623_v3 = vld [vmem:[%s770_s3 + $0x30] sm:$0xff]   ;;  %v624_v4 = vld [vmem:[%s770_s3 + $0x28] sm:$0xff]  }
   0xd   : > { %620 = vset.pattern.permute.xlu0 %v664_v1  ;;  %573 = vmatprep.subr.bf16.mxu0 %v665_v2  ;;  %s716_s23 = sshll.u32 %s777_s15, 3  ;;  %v625_v7 = vld [vmem:[%s770_s3 + $0x20] sm:$0xff]   ;;  %v626_v8 = vld [vmem:[%s770_s3 + $0x18] sm:$0xff]   ;;  %v627_v9 = vld [vmem:[%s770_s3 + $0x10] sm:$0xff]   ;;  %vm666_vm0 = vmmov 0   ;;  %vm265_vm1 = vcmask 7168  }
   0xe   : > { %574 = vmatpush3.bf16.msra.mxu0 %v622_v0  ;;  %621 = vset.pattern.permute.xlu1 %v664_v1  ;;  %s240_s28 = scalar_lea.vmem %s767_s0, %s716_s23  ;;  %s244_s5 = scalar_lea.vmem %s768_s1, %s716_s23  ;;  %v628_v10 = vld [vmem:[%s770_s3 + $0x8] sm:$0xff]   ;;  %v629_v11 = vld [vmem:[%s770_s3] sm:$0xff]   ;;  %266 = vst.msk [vmem:[#allocation3] sm:$0xff] %vm265_vm1, %v665_v2  ;;  %vm263_vm3 = vcmask 31744  }
   0xf   : > { %575 = vmatprep.subr.bf16.mxu0 %v665_v2  ;;  %v267_v5 = vld [vmem:[%s240_s28] sm:$0xff]  ;;  %589 = vmatprep.mubr.msk.bf16.mxu0 %vm666_vm0, %v665_v2  ;;  %264 = vst.msk [vmem:[#allocation2] sm:$0xff] %vm263_vm3, %v665_v2  ;;  %s257_s24 = scalar_lea.vmem %s771_s4, %s716_s23 }
  0x10   : > { %288 = vperm.xlu0 %620, %v267_v5   ;;  %v268_v6 = vld [vmem:[%s244_s5] sm:$0xff] }
  0x11   : > { %v552_v12 = vld [vmem:[%s769_s2] ss:$0 sm:$0xff] }
  0x12   : > { %576 = vmatpush3.bf16.msra.mxu0 %v623_v3 }
  0x13   : > { %577 = vmatprep.subr.bf16.mxu0 %v665_v2 }
  0x14   : > { %303 = vperm.xlu0 %620, %v268_v6  }
  0x15   : > { %v309_v22 = vld [vmem:[#allocation3] sm:$0xff] }
  0x16   : > { %578 = vmatpush3.bf16.msra.mxu0 %v624_v4  ;;  %v315_v27 = vld [vmem:[#allocation2] sm:$0xff] }
  0x17   : > { %579 = vmatprep.subr.bf16.mxu0 %v665_v2 }
  0x1a   : > { %580 = vmatpush3.bf16.msra.mxu0 %v625_v7 }
  0x1b   : > { %581 = vmatprep.subr.bf16.mxu0 %v665_v2 }
  0x1e   : > { %582 = vmatpush3.bf16.msra.mxu0 %v626_v8 }
  0x1f   : > { %583 = vmatprep.subr.bf16.mxu0 %v665_v2 }
  0x22   : > { %584 = vmatpush3.bf16.msra.mxu0 %v627_v9 }
  0x23   : > { %585 = vmatprep.subr.bf16.mxu0 %v665_v2 }
  0x26   : > { %586 = vmatpush3.bf16.msra.mxu0 %v628_v10 }
  0x27   : > { %587 = vmatprep.subr.bf16.mxu0 %v665_v2 }
  0x2a   : > { %588 = vmatpush3.bf16.msra.mxu0 %v629_v11 }
  0x8b   : > { %v289_v13 = vpop.permute.xlu0 %288 }
  0x8c   : > { %v297_v14 = vadd.f32 %v552_v12, %v289_v13 }
  0x8e   : > { %v299_v15 = vmul.f32 0.2, %v297_v14  ;;  %vm298_vm2 = vcmp.gt.f32.partialorder %v297_v14, 0.0 }
  0x8f   : > { %v304_v16 = vpop.permute.xlu0 %303 }
  0x90   : > { %v300_v17 = vsel %vm298_vm2, %v297_v14, %v299_v15 }
  0x91   : > { %v306_v18 = vsub.f32 %v300_v17, %v304_v16 }
  0x93   : > { %v307_v19 = vmul.f32 1.442695, %v306_v18 }
  0x95   : > { %630 = vpow2.f32 %v307_v19 }
  0xa2   : > { %v631_v20 = vpop.eup %630 }
  0xa3   : > { %310 = vadd.xlane.f32.xlu1 %v631_v20  ;;  %v316_v21 = vpack.c.bf16 %v631_v20, %v631_v20 }
  0xa5   : > { %590 = vmatmul.mubr.bf16.vlgmr.msra.gmra.mxu0 %v316_v21 }
 0x12c   : > { %v311_v23 = vpop.xlane.xlu1 %310 }
 0x12d   : > { %v312_v24 = vadd.f32 %v311_v23, %v309_v22 }
 0x12f   : > { %314 = vst.msk [vmem:[#allocation3] sm:$0xff] %vm265_vm1, %v312_v24 }
 0x136   : > { %v412_v25 = vld [vmem:[#allocation3] sm:$0xff] }
 0x137   : > { %632 = vrcp.f32 %v412_v25 }
 0x144   : > { %v633_v26 = vpop.eup %632 }
 0x145   : > { %416 = vperm.xlu1 %621, %v633_v26  }
 0x165   : > { %v399_v28 = vpop.f32.mrf.mxu0 }
 0x166   : > { %v405_v29 = vadd.f32 %v399_v28, %v315_v27 }
 0x167   : > { %v591_v30 = vpop.f32.mrf.mxu0 }
 0x168   : > { %407 = vst.msk [vmem:[#allocation2] sm:$0xff] %vm263_vm3, %v405_v29 }
 0x169   : > { %v402_v31 = vpop.f32.mrf.mxu0 }
 0x16b   : > { %v592_v32 = vpop.f32.mrf.mxu0 }
 0x16f   : > { %v411_v34 = vld [vmem:[#allocation2] sm:$0xff] }
 0x1c0   : > { %v417_v33 = vpop.permute.xlu1 %416 }
 0x1c1   : > { %v419_v35 = vmul.f32 %v417_v33, %v411_v34 }
 0x1c3   : > { %v421_v36 = vmin.f32 %v419_v35, 0.0  ;;  %vm420_vm4 = vcmp.gt.f32.partialorder %v419_v35, 0.0 }
 0x1c5   : > { %v422_v37 = vmul.f32 1.442695, %v421_v36 }
 0x1c7   : > { %634 = vpow2.f32 %v422_v37 }
 0x1d4   : > { %v635_v38 = vpop.eup %634 }
 0x1d5   : > { %v561_v39 = vadd.f32 -1.0, %v635_v38 }
 0x1d7   : > { %v425_v40 = vsel %vm420_vm4, %v419_v35, %v561_v39 }
 0x1d8   : > { %v426_v41 = vsel %vm263_vm3, %v425_v40, -inf }
 0x1d9   : > { %427 = vmax.xlane.f32.xlu0 %v426_v41 }
 0x262   : > { %v428_v42 = vpop.xlane.xlu0 %427 }
 0x263   : > { %v429_v43 = vsub.f32 %v425_v40, %v428_v42 }
 0x265   : > { %v430_v44 = vmul.f32 1.442695, %v429_v43 }
 0x267   : > { %636 = vpow2.f32 %v430_v44 }
 0x274   : > { %v637_v45 = vpop.eup %636 }
 0x275   : > { %v432_v46 = vsel %vm263_vm3, %v637_v45, 0.0 }
 0x276   : > { %433 = vadd.xlane.f32.xlu1 %v432_v46 }
 0x2ff   : > { %v434_v47 = vpop.xlane.xlu1 %433 }
 0x300   : > { %638 = vlog2.f32 %v434_v47 }
 0x30d   : > { %v639_v48 = vpop.eup %638 }
 0x30e   : > { %v436_v49 = vmul.f32 0.6931472, %v639_v48 }
 0x310   : > { %v437_v50 = vadd.f32 %v436_v49, %v428_v42 }
 0x312   : > { %v438_v51 = vsub.f32 %v425_v40, %v437_v50 }
 0x314   : > { %v439_v52 = vsel %vm263_vm3, %v438_v51, 0.0 }
 0x315   : > { %440 = vst [vmem:[%s257_s24] sm:$0xff] %v439_v52 }
 0x316 PF: > { %s14_s17 = sadd.s32 1, %s662_s17   ;;  %s772_s15 = smov %s658_s16 }
 0x317   : > { %p11_p5 = scmp.ge.s32.totalorder %s14_s17, 4   ;;  %s773_s16 = smov %s775_s18 }
 0x319   :  { %13 = sbr.rel (!%p11_p5) target bundleno = 2 (0x2), region = 83 }

// kernel: spatial_gat_forward.2
= control target key start
LH: loop header
LB: loop body
LE: loop exit
PB: predicated region body
PF: predicated region fallthrough
CT: control target
= control target key end

     0   :  { %s1751_s15 = smov 0   ;;  %s1753_s16 = smov 0   ;;  %s2102_s0 = inlined_call_operand.vmem [shape: f32[16,8], index: 0, kind: input, shape index: {}]   ;;  %s2103_s1 = inlined_call_operand.vmem [shape: f32[16,8], index: 1, kind: input, shape index: {}]   ;;  %s2104_s2 = inlined_call_operand.vmem [shape: f32[8,128], index: 2, kind: input, shape index: {}]   ;;  %s2105_s3 = inlined_call_operand.vmem [shape: bf16[128,64], index: 3, kind: input, shape index: {}]   ;;  %s2106_s4 = inlined_call_operand.vmem [shape: f32[16,128], index: 4, kind: output, shape index: {}]  }
   0x1   :  { %s1755_s17 = smov 0  }
   0x2 LB: > { %s26_s18 = sadd.s32 1, %s1696_s16  ;;  %p1316_p0 = scmp.ge.s32.totalorder %s1700_s17, 1  ;;  %s1700_s17 = sphi %s1755_s17, %s14_s17   ;;  %s1696_s16 = sphi %s1753_s16, %s2108_s16   ;;  %s1692_s15 = sphi %s1751_s15, %s2107_s15  }
   0x3   : > { %p28_p1 = scmp.ge.s32.totalorder %s26_s18, 2  ;;  %p202_p2 = scmp.lt.s32.totalorder %s1700_s17, 3 }
   0x5   : > { %s2110_s18 = smov (%p28_p1, %s26_s18), 0  ;;  %p203_p3 = pnand %p1316_p0, %p202_p2 }
   0x6   : > { %p239_p4 = scmp.lt.s32.totalorder (!%p203_p3), %s1692_s15, 1  ;;  %s1702_s21 = smov (!%p203_p3), 120  }
   0x7   : > { %206 = sbr.rel (%p203_p3) target bundleno = 768 (0x300), region = 36  ;;  %s1710_s23 = smov (!%p203_p3), 104  }
   0x8   : > { %s1714_s24 = smov (!%p203_p3), 88   ;;  %s1718_s26 = smov (!%p203_p3), 72  }
   0x9   : > { %s1719_s29 = smov (!%p203_p3), 8   ;;  %s1720_s30 = smov (!%p203_p3), 16  }
   0xa   : > { %s1721_s5 = smov (!%p203_p3), 24   ;;  %s1722_s6 = smov (!%p203_p3), 32  }
   0xb   : > { %s1723_s7 = smov (!%p203_p3), 40   ;;  %s1724_s8 = smov (!%p203_p3), 48  }
   0xc   : > { %v1772_v0 = vld [vmem:[%s2105_s3 + $0x38] sm:$0xff]   ;;  %v1703_v1 = vmov 0   ;;  %v1704_v2 = vmov 1   ;;  %s2112_s15 = smov (!%p239_p4, %s1692_s15), 1  ;;  %v1705_v5 = vmov 0.0   ;;  %v1802_v6 = vld [vmem:[%s2105_s3 + $0x20] sm:$0xff]   ;;  %v294_v20 = vlaneseq }
   0xd   : > { %450 = vrot.lane.b32.xlu1 %v1772_v0, %s1702_s21  ;;  %1618 = vset.pattern.permute.xlu0 %v1703_v1  ;;  %s1778_s22 = sshll.u32 %s2112_s15, 3  ;;  %v1807_v7 = vld [vmem:[%s2105_s3 + $0x30] sm:$0xff]   ;;  %v1823_v9 = vld [vmem:[%s2105_s3 + $0x28] sm:$0xff]   ;;  %v1706_v10 = vmov 2   ;;  %v1707_v11 = vmov 6   ;;  %v1841_v13 = vld [vmem:[%s2105_s3 + $0x18] sm:$0xff]  }
   0xe   : > { %1619 = vset.pattern.permute.xlu1 %v1704_v2  ;;  %s242_s25 = scalar_lea.vmem %s2102_s0, %s1778_s22  ;;  %s246_s28 = scalar_lea.vmem %s2103_s1, %s1778_s22  ;;  %1430 = vmatprep.subr.bf16.mxu1 %v1705_v5  ;;  %v1818_v8 = vld [vmem:[%s2105_s3 + $0x10] sm:$0xff]   ;;  %v1836_v12 = vld [vmem:[%s2105_s3 + $0x8] sm:$0xff]   ;;  %v1858_v14 = vld [vmem:[%s2105_s3] sm:$0xff]   ;;  %vm1709_vm0 = vmmov 0   ;;  %v1711_v15 = vmov 3   ;;  %v1712_v16 = vmov 4  }
   0xf   : > { %v1788_v3 = vld [vmem:[%s242_s25] sm:$0xff]  ;;  %1410 = vmatprep.subr.bf16.mxu0 %v1705_v5  ;;  %s1708_s15 = smov 112   ;;  %1426 = vmatprep.mubr.msk.bf16.mxu0 %vm1709_vm0, %v1705_v5  ;;  %v1715_v17 = vmov 5   ;;  %v1716_v18 = vmov 7   ;;  %s1717_s25 = smov 80   ;;  %v1933_v21 = vshrl.u32 %v294_v20, 7 }
  0x10   : > { %291 = vperm.xlu0 %1618, %v1788_v3   ;;  %v1792_v4 = vld [vmem:[%s246_s28] sm:$0xff]  ;;  %1411 = vmatpush3.bf16.msra.mxu0 %v1772_v0  ;;  %vm268_vm5 = vcmask 64512   ;;  %vm266_vm8 = vcmask 523264   ;;  %vm314_vm11 = vcmask 7168   ;;  %vm432_vm12 = vcmask 15368   ;;  %s1725_s9 = smov 56   ;;  %s260_s12 = scalar_lea.vmem %s2106_s4, %s1778_s22 }
  0x11   : > { %410 = vperm.xlu1 %1619, %v1788_v3   ;;  %1412 = vmatprep.subr.bf16.mxu0 %v1705_v5  ;;  %v415_v22 = vsub.s32 1, %v1933_v21  ;;  %v296_v23 = vsub.s32 0, %v1933_v21  ;;  %v1945_v24 = vld [vmem:[%s2104_s2] sm:$0xff]  ;;  %v513_v47 = vsub.s32 2, %v1933_v21  ;;  %v611_v60 = vsub.s32 3, %v1933_v21  ;;  %269 = vst.msk [vmem:[#allocation3] sm:$0xff] %vm268_vm5, %v1705_v5 }
  0x12   : > { %1446 = vmatprep.mubr.msk.bf16.mxu1 %vm1709_vm0, %v1705_v5  ;;  %267 = vst.msk [vmem:[#allocation2] sm:$0xff] %vm266_vm8, %v1705_v5  ;;  %vm530_vm13 = vcmask 23568   ;;  %vm628_vm14 = vcmask 31768   ;;  %vm726_vm15 = vcmask 39968  }
  0x13   : > { %v416_v25 = vrot.slane %v1945_v24, %v415_v22  ;;  %v297_v26 = vrot.slane %v1945_v24, %v296_v23  ;;  %v514_v50 = vrot.slane %v1945_v24, %v513_v47 }
  0x14   : > { %304 = vperm.xlu0 %1618, %v1792_v4   ;;  %1413 = vmatpush3.bf16.msra.mxu0 %v1807_v7 }
  0x15   : > { %422 = vperm.xlu1 %1619, %v1792_v4   ;;  %1414 = vmatprep.subr.bf16.mxu0 %v1705_v5 }
  0x18   : > { %448 = vrot.lane.b32.xlu0 %v1807_v7, %s1702_s21  ;;  %1415 = vmatpush3.bf16.msra.mxu0 %v1823_v9 }
  0x19   : > { %444 = vrot.lane.b32.xlu1 %v1802_v6, %s1702_s21  ;;  %1620 = vset.pattern.permute.xlu0 %v1706_v10 }
  0x1a   : > { %1624 = vset.pattern.permute.xlu1 %v1707_v11  ;;  %1416 = vmatprep.subr.bf16.mxu0 %v1705_v5 }
  0x1c   : > { %446 = vrot.lane.b32.xlu0 %v1823_v9, %s1702_s21  ;;  %1417 = vmatpush3.bf16.msra.mxu0 %v1802_v6 }
  0x1d   : > { %440 = vrot.lane.b32.xlu1 %v1818_v8, %s1702_s21  ;;  %1418 = vmatprep.subr.bf16.mxu0 %v1705_v5 }
  0x20   : > { %442 = vrot.lane.b32.xlu0 %v1841_v13, %s1702_s21  ;;  %1419 = vmatpush3.bf16.msra.mxu0 %v1841_v13 }
  0x21   : > { %438 = vrot.lane.b32.xlu1 %v1836_v12, %s1702_s21  ;;  %1420 = vmatprep.subr.bf16.mxu0 %v1705_v5 }
  0x24   : > { %548 = vrot.lane.b32.xlu0 %v1772_v0, %s1708_s15  ;;  %1421 = vmatpush3.bf16.msra.mxu0 %v1818_v8 }
  0x25   : > { %546 = vrot.lane.b32.xlu1 %v1807_v7, %s1708_s15  ;;  %1422 = vmatprep.subr.bf16.mxu0 %v1705_v5 }
  0x28   : > { %508 = vperm.xlu0 %1620, %v1788_v3   ;;  %1423 = vmatpush3.bf16.msra.mxu0 %v1836_v12 }
  0x29   : > { %436 = vrot.lane.b32.xlu1 %v1858_v14, %s1702_s21  ;;  %1424 = vmatprep.subr.bf16.mxu0 %v1705_v5  ;;  %s1713_s21 = smov 96  }
  0x2c   : > { %520 = vperm.xlu0 %1620, %v1792_v4   ;;  %1425 = vmatpush3.bf16.msra.mxu0 %v1858_v14 }
  0x2d   : > { %544 = vrot.lane.b32.xlu1 %v1823_v9, %s1708_s15  ;;  %1450 = vmatprep.subr.bf16.mxu0 %v1705_v5 }
  0x30   : > { %646 = vrot.lane.b32.xlu0 %v1772_v0, %s1710_s23 }
  0x31   : > { %542 = vrot.lane.b32.xlu1 %v1802_v6, %s1708_s15  ;;  %1621 = vset.pattern.permute.xlu0 %v1711_v15 }
  0x34   : > { %606 = vperm.xlu0 %1621, %v1788_v3  }
  0x35   : > { %644 = vrot.lane.b32.xlu1 %v1807_v7, %s1710_s23 }
  0x38   : > { %618 = vperm.xlu0 %1621, %v1792_v4  }
  0x39   : > { %540 = vrot.lane.b32.xlu1 %v1841_v13, %s1708_s15 }
  0x3c   : > { %538 = vrot.lane.b32.xlu0 %v1818_v8, %s1708_s15 }
  0x3d   : > { %642 = vrot.lane.b32.xlu1 %v1823_v9, %s1710_s23  ;;  %1622 = vset.pattern.permute.xlu0 %v1712_v16 }
  0x40   : > { %536 = vrot.lane.b32.xlu0 %v1836_v12, %s1708_s15 }
  0x41   : > { %640 = vrot.lane.b32.xlu1 %v1802_v6, %s1710_s23 }
  0x44   : > { %534 = vrot.lane.b32.xlu0 %v1858_v14, %s1708_s15 }
  0x45   : > { %638 = vrot.lane.b32.xlu1 %v1841_v13, %s1710_s23 }
  0x48   : > { %744 = vrot.lane.b32.xlu0 %v1772_v0, %s1713_s21 }
  0x49   : > { %636 = vrot.lane.b32.xlu1 %v1818_v8, %s1710_s23 }
  0x4c   : > { %704 = vperm.xlu0 %1622, %v1788_v3  }
  0x4d   : > { %634 = vrot.lane.b32.xlu1 %v1836_v12, %s1710_s23 }
  0x50   : > { %716 = vperm.xlu0 %1622, %v1792_v4  }
  0x51   : > { %742 = vrot.lane.b32.xlu1 %v1807_v7, %s1713_s21 }
  0x54   : > { %842 = vrot.lane.b32.xlu0 %v1772_v0, %s1714_s24 }
  0x55   : > { %632 = vrot.lane.b32.xlu1 %v1858_v14, %s1710_s23  ;;  %1623 = vset.pattern.permute.xlu0 %v1715_v17 }
  0x58   : > { %802 = vperm.xlu0 %1623, %v1788_v3  }
  0x59   : > { %740 = vrot.lane.b32.xlu1 %v1823_v9, %s1713_s21 }
  0x5c   : > { %814 = vperm.xlu0 %1623, %v1792_v4  }
  0x5d   : > { %738 = vrot.lane.b32.xlu1 %v1802_v6, %s1713_s21 }
  0x60   : > { %734 = vrot.lane.b32.xlu0 %v1818_v8, %s1713_s21 }
  0x61   : > { %840 = vrot.lane.b32.xlu1 %v1807_v7, %s1714_s24  ;;  %1625 = vset.pattern.permute.xlu0 %v1716_v18 }
  0x64   : > { %732 = vrot.lane.b32.xlu0 %v1836_v12, %s1713_s21 }
  0x65   : > { %736 = vrot.lane.b32.xlu1 %v1841_v13, %s1713_s21 }
  0x68   : > { %730 = vrot.lane.b32.xlu0 %v1858_v14, %s1713_s21 }
  0x69   : > { %838 = vrot.lane.b32.xlu1 %v1823_v9, %s1714_s24 }
  0x6c   : > { %940 = vrot.lane.b32.xlu0 %v1772_v0, %s1717_s25 }
  0x6d   : > { %836 = vrot.lane.b32.xlu1 %v1802_v6, %s1714_s24 }
  0x70   : > { %830 = vrot.lane.b32.xlu0 %v1836_v12, %s1714_s24 }
  0x71   : > { %834 = vrot.lane.b32.xlu1 %v1841_v13, %s1714_s24 }
  0x74   : > { %828 = vrot.lane.b32.xlu0 %v1858_v14, %s1714_s24 }
  0x75   : > { %832 = vrot.lane.b32.xlu1 %v1818_v8, %s1714_s24 }
  0x78   : > { %936 = vrot.lane.b32.xlu0 %v1823_v9, %s1717_s25 }
  0x79   : > { %900 = vperm.xlu1 %1624, %v1788_v3  }
  0x7c   : > { %998 = vperm.xlu0 %1625, %v1788_v3   ;;  %v612_v3 = vrot.slane %v1945_v24, %v611_v60 }
  0x7d   : > { %938 = vrot.lane.b32.xlu1 %v1807_v7, %s1717_s25 }
  0x7f   : > { %v451_v19 = vpop.permute.xlu1 %450 }
  0x80   : > { %1431 = vmatpush3.bf16.msra.mxu1 %v451_v19  ;;  %932 = vrot.lane.b32.xlu0 %v1841_v13, %s1717_s25 }
  0x81   : > { %1432 = vmatprep.subr.bf16.mxu1 %v1705_v5  ;;  %912 = vperm.xlu1 %1624, %v1792_v4  }
  0x82   : > { %1629 = vset.pattern.permute.xlu0 %v1706_v10 }
  0x84   : > { %1034 = vrot.lane.b32.xlu0 %v1823_v9, %s1718_s26 }
  0x85   : > { %1038 = vrot.lane.b32.xlu1 %v1772_v0, %s1718_s26 }
  0x86   : > { %1626 = vset.pattern.permute.xlu1 %v1716_v18 }
  0x88   : > { %1032 = vrot.lane.b32.xlu0 %v1802_v6, %s1718_s26 }
  0x89   : > { %934 = vrot.lane.b32.xlu1 %v1802_v6, %s1717_s25 }
  0x8b   : > { %v292_v28 = vpop.permute.xlu0 %291 }
  0x8c   : > { %v411_v27 = vpop.permute.xlu1 %410  ;;  %v298_v30 = vadd.f32 %v297_v26, %v292_v28  ;;  %1030 = vrot.lane.b32.xlu0 %v1841_v13, %s1718_s26 }
  0x8d   : > { %v417_v29 = vadd.f32 %v416_v25, %v411_v27  ;;  %1036 = vrot.lane.b32.xlu1 %v1807_v7, %s1718_s26 }
  0x8e   : > { %v300_v31 = vmul.f32 0.2, %v298_v30  ;;  %vm299_vm1 = vcmp.gt.f32.partialorder %v298_v30, 0.0 }
  0x8f   : > { %v419_v32 = vmul.f32 0.2, %v417_v29  ;;  %v305_v34 = vpop.permute.xlu0 %304  ;;  %vm418_vm2 = vcmp.gt.f32.partialorder %v417_v29, 0.0 }
  0x90   : > { %v423_v33 = vpop.permute.xlu1 %422  ;;  %v301_v35 = vsel %vm299_vm1, %v298_v30, %v300_v31  ;;  %1028 = vrot.lane.b32.xlu0 %v1818_v8, %s1718_s26  ;;  %vm505_vm1 = vcmask 130112  }
  0x91   : > { %1010 = vperm.xlu1 %1626, %v1792_v4   ;;  %v307_v36 = vsub.f32 %v301_v35, %v305_v34  ;;  %v420_v37 = vsel %vm418_vm2, %v417_v29, %v419_v32  ;;  %v709_v29 = vsub.s32 4, %v1933_v21  ;;  %vm603_vm2 = vcmask 195712  }
  0x92   : > { %v425_v41 = vsub.f32 %v420_v37, %v423_v33 }
  0x93   : > { %v308_v38 = vmul.f32 1.442695, %v307_v36  ;;  %v449_v40 = vpop.permute.xlu0 %448  ;;  %v710_v33 = vrot.slane %v1945_v24, %v709_v29 }
  0x94   : > { %v445_v39 = vpop.permute.xlu1 %444  ;;  %1024 = vrot.lane.b32.xlu0 %v1858_v14, %s1718_s26  ;;  %1433 = vmatpush3.bf16.msra.mxu1 %v449_v40  ;;  %v426_v44 = vmul.f32 1.442695, %v425_v41 }
  0x95   : > { %930 = vrot.lane.b32.xlu1 %v1818_v8, %s1717_s25  ;;  %1644 = vpow2.f32 %v308_v38  ;;  %1434 = vmatprep.subr.bf16.mxu1 %v1705_v5 }
  0x96   : > { %1627 = vset.pattern.permute.xlu1 %v1703_v1  ;;  %1646 = vpow2.f32 %v426_v44 }
  0x97   : > { %v447_v43 = vpop.permute.xlu0 %446 }
  0x98   : > { %v441_v42 = vpop.permute.xlu1 %440  ;;  %1435 = vmatpush3.bf16.msra.mxu1 %v447_v43 }
  0x99   : > { %928 = vrot.lane.b32.xlu1 %v1836_v12, %s1717_s25  ;;  %1436 = vmatprep.subr.bf16.mxu1 %v1705_v5 }
  0x9b   : > { %v443_v46 = vpop.permute.xlu0 %442 }
  0x9c   : > { %v439_v45 = vpop.permute.xlu1 %438  ;;  %1437 = vmatpush3.bf16.msra.mxu1 %v445_v39 }
  0x9d   : > { %926 = vrot.lane.b32.xlu1 %v1858_v14, %s1717_s25  ;;  %1438 = vmatprep.subr.bf16.mxu1 %v1705_v5 }
  0x9f   : > { %v549_v49 = vpop.permute.xlu0 %548 }
  0xa0   : > { %v547_v48 = vpop.permute.xlu1 %546  ;;  %1439 = vmatpush3.bf16.msra.mxu1 %v443_v46 }
  0xa1   : > { %1026 = vrot.lane.b32.xlu1 %v1836_v12, %s1718_s26  ;;  %1440 = vmatprep.subr.bf16.mxu1 %v1705_v5 }
  0xa2   : > { %v1978_v51 = vpop.eup %1644 }
  0xa3   : > { %v509_v53 = vpop.permute.xlu0 %508  ;;  %v317_v55 = vpack.c.bf16 %v1978_v51, %v1978_v51  ;;  %v1647_v62 = vpop.eup %1646 }
  0xa4   : > { %v437_v52 = vpop.permute.xlu1 %436  ;;  %v515_v54 = vadd.f32 %v514_v50, %v509_v53  ;;  %1441 = vmatpush3.bf16.msra.mxu1 %v441_v42  ;;  %v435_v4 = vpack.c.bf16 %v1647_v62, %v1647_v62  ;;  %v807_v42 = vsub.s32 5, %v1933_v21 }
  0xa5   : > { %1427 = vmatmul.mubr.bf16.vlgmr.msra.gmra.mxu0 %v317_v55  ;;  %1442 = vmatprep.subr.bf16.mxu1 %v1705_v5 }
  0xa6   : > { %v517_v56 = vmul.f32 0.2, %v515_v54  ;;  %vm516_vm3 = vcmp.gt.f32.partialorder %v515_v54, 0.0  ;;  %1451 = vmatpush3.bf16.msra.mxu0 %v549_v49  ;;  %1466 = vmatprep.mubr.msk.bf16.mxu0 %vm1709_vm0, %v1705_v5  ;;  %v808_v47 = vrot.slane %v1945_v24, %v807_v42 }
  0xa7   : > { %v521_v58 = vpop.permute.xlu0 %520  ;;  %1452 = vmatprep.subr.bf16.mxu0 %v1705_v5 }
  0xa8   : > { %v545_v57 = vpop.permute.xlu1 %544  ;;  %v518_v59 = vsel %vm516_vm3, %v515_v54, %v517_v56  ;;  %1443 = vmatpush3.bf16.msra.mxu1 %v439_v45  ;;  %vm922_vm3 = vcmask 56368  }
  0xa9   : > { %v523_v61 = vsub.f32 %v518_v59, %v521_v58  ;;  %1444 = vmatprep.subr.bf16.mxu1 %v1705_v5 }
  0xaa   : > { %1453 = vmatpush3.bf16.msra.mxu0 %v547_v48 }
  0xab   : > { %v524_v63 = vmul.f32 1.442695, %v523_v61  ;;  %v647_v1 = vpop.permute.xlu0 %646  ;;  %1454 = vmatprep.subr.bf16.mxu0 %v1705_v5 }
  0xac   : > { %v543_v0 = vpop.permute.xlu1 %542  ;;  %1445 = vmatpush3.bf16.msra.mxu1 %v437_v52 }
  0xad   : > { %1648 = vpow2.f32 %v524_v63  ;;  %1470 = vmatprep.subr.bf16.mxu1 %v1705_v5 }
  0xae   : > { %1455 = vmatpush3.bf16.msra.mxu0 %v545_v57 }
  0xaf   : > { %v607_v7 = vpop.permute.xlu0 %606  ;;  %1447 = vmatmul.mubr.bf16.vlgmr.msra.gmra.mxu1 %v435_v4  ;;  %1456 = vmatprep.subr.bf16.mxu0 %v1705_v5 }
  0xb0   : > { %v645_v6 = vpop.permute.xlu1 %644  ;;  %v613_v8 = vadd.f32 %v612_v3, %v607_v7  ;;  %1471 = vmatpush3.bf16.msra.mxu1 %v647_v1  ;;  %1486 = vmatprep.mubr.msk.bf16.mxu1 %vm1709_vm0, %v1705_v5 }
  0xb1   : > { %1472 = vmatprep.subr.bf16.mxu1 %v1705_v5 }
  0xb2   : > { %v615_v9 = vmul.f32 0.2, %v613_v8  ;;  %vm614_vm4 = vcmp.gt.f32.partialorder %v613_v8, 0.0  ;;  %1457 = vmatpush3.bf16.msra.mxu0 %v543_v0 }
  0xb3   : > { %429 = vadd.xlane.f32.xlu0 %v1647_v62  ;;  %v619_v12 = vpop.permute.xlu0 %618  ;;  %1458 = vmatprep.subr.bf16.mxu0 %v1705_v5 }
  0xb4   : > { %v541_v10 = vpop.permute.xlu1 %540  ;;  %v616_v13 = vsel %vm614_vm4, %v613_v8, %v615_v9  ;;  %1473 = vmatpush3.bf16.msra.mxu1 %v645_v6  ;;  %v905_v9 = vsub.s32 6, %v1933_v21  ;;  %vm701_vm4 = vcmask 261312  }
  0xb5   : > { %v621_v14 = vsub.f32 %v616_v13, %v619_v12  ;;  %1474 = vmatprep.subr.bf16.mxu1 %v1705_v5 }
  0xb6   : > { %1459 = vmatpush3.bf16.msra.mxu0 %v541_v10  ;;  %v906_v13 = vrot.slane %v1945_v24, %v905_v9 }
  0xb7   : > { %v622_v19 = vmul.f32 1.442695, %v621_v14  ;;  %v539_v22 = vpop.permute.xlu0 %538  ;;  %1460 = vmatprep.subr.bf16.mxu0 %v1705_v5 }
  0xb8   : > { %v643_v20 = vpop.permute.xlu1 %642 }
  0xb9   : > { %1650 = vpow2.f32 %v622_v19  ;;  %1475 = vmatpush3.bf16.msra.mxu1 %v643_v20 }
  0xba   : > { %v1649_v23 = vpop.eup %1648  ;;  %1476 = vmatprep.subr.bf16.mxu1 %v1705_v5  ;;  %1461 = vmatpush3.bf16.msra.mxu0 %v539_v22 }
  0xbb   : > { %527 = vadd.xlane.f32.xlu0 %v1649_v23  ;;  %v537_v26 = vpop.permute.xlu0 %536  ;;  %1462 = vmatprep.subr.bf16.mxu0 %v1705_v5  ;;  %v533_v32 = vpack.c.bf16 %v1649_v23, %v1649_v23 }
  0xbc   : > { %v641_v25 = vpop.permute.xlu1 %640 }
  0xbd   : > { %1477 = vmatpush3.bf16.msra.mxu1 %v641_v25 }
  0xbe   : > { %1478 = vmatprep.subr.bf16.mxu1 %v1705_v5  ;;  %1463 = vmatpush3.bf16.msra.mxu0 %v537_v26  ;;  %v1003_v26 = vsub.s32 7, %v1933_v21 }
  0xbf   : > { %v535_v28 = vpop.permute.xlu0 %534  ;;  %1464 = vmatprep.subr.bf16.mxu0 %v1705_v5 }
  0xc0   : > { %v639_v27 = vpop.permute.xlu1 %638 }
  0xc1   : > { %1479 = vmatpush3.bf16.msra.mxu1 %v639_v27 }
  0xc2   : > { %1480 = vmatprep.subr.bf16.mxu1 %v1705_v5  ;;  %1465 = vmatpush3.bf16.msra.mxu0 %v535_v28 }
  0xc3   : > { %v745_v31 = vpop.permute.xlu0 %744  ;;  %1490 = vmatprep.subr.bf16.mxu0 %v1705_v5 }
  0xc4   : > { %v637_v30 = vpop.permute.xlu1 %636 }
  0xc5   : > { %311 = vadd.xlane.f32.xlu1 %v1978_v51  ;;  %1481 = vmatpush3.bf16.msra.mxu1 %v637_v30  ;;  %v1004_v30 = vrot.slane %v1945_v24, %v1003_v26 }
  0xc6   : > { %v1651_v34 = vpop.eup %1650  ;;  %1467 = vmatmul.mubr.bf16.vlgmr.msra.gmra.mxu0 %v533_v32  ;;  %1482 = vmatprep.subr.bf16.mxu1 %v1705_v5 }
  0xc7   : > { %625 = vadd.xlane.f32.xlu0 %v1651_v34  ;;  %v705_v36 = vpop.permute.xlu0 %704  ;;  %1491 = vmatpush3.bf16.msra.mxu0 %v745_v31  ;;  %v631_v48 = vpack.c.bf16 %v1651_v34, %v1651_v34 }
  0xc8   : > { %v635_v35 = vpop.permute.xlu1 %634  ;;  %v711_v37 = vadd.f32 %v710_v33, %v705_v36  ;;  %1492 = vmatprep.subr.bf16.mxu0 %v1705_v5  ;;  %1506 = vmatprep.mubr.msk.bf16.mxu0 %vm1709_vm0, %v1705_v5 }
  0xc9   : > { %1483 = vmatpush3.bf16.msra.mxu1 %v635_v35 }
  0xca   : > { %1484 = vmatprep.subr.bf16.mxu1 %v1705_v5  ;;  %v713_v38 = vmul.f32 0.2, %v711_v37  ;;  %vm712_vm6 = vcmp.gt.f32.partialorder %v711_v37, 0.0 }
  0xcb   : > { %v717_v40 = vpop.permute.xlu0 %716 }
  0xcc   : > { %v743_v39 = vpop.permute.xlu1 %742  ;;  %v714_v41 = vsel %vm712_vm6, %v711_v37, %v713_v38  ;;  %vm1020_vm6 = vcmask 64568  }
  0xcd   : > { %1493 = vmatpush3.bf16.msra.mxu0 %v743_v39  ;;  %v719_v43 = vsub.f32 %v714_v41, %v717_v40 }
  0xce   : > { %1494 = vmatprep.subr.bf16.mxu0 %v1705_v5 }
  0xcf   : > { %v720_v45 = vmul.f32 1.442695, %v719_v43  ;;  %v843_v46 = vpop.permute.xlu0 %842 }
  0xd0   : > { %v633_v44 = vpop.permute.xlu1 %632 }
  0xd1   : > { %1485 = vmatpush3.bf16.msra.mxu1 %v633_v44  ;;  %1652 = vpow2.f32 %v720_v45 }
  0xd2   : > { %1510 = vmatprep.subr.bf16.mxu1 %v1705_v5 }
  0xd3   : > { %v803_v49 = vpop.permute.xlu0 %802 }
  0xd4   : > { %1487 = vmatmul.mubr.bf16.vlgmr.msra.gmra.mxu1 %v631_v48  ;;  %v741_v50 = vpop.permute.xlu1 %740  ;;  %v809_v51 = vadd.f32 %v808_v47, %v803_v49 }
  0xd5   : > { %1495 = vmatpush3.bf16.msra.mxu0 %v741_v50  ;;  %1511 = vmatpush3.bf16.msra.mxu1 %v843_v46 }
  0xd6   : > { %1496 = vmatprep.subr.bf16.mxu0 %v1705_v5  ;;  %1512 = vmatprep.subr.bf16.mxu1 %v1705_v5  ;;  %v811_v52 = vmul.f32 0.2, %v809_v51  ;;  %vm810_vm7 = vcmp.gt.f32.partialorder %v809_v51, 0.0 }
  0xd7   : > { %1526 = vmatprep.mubr.msk.bf16.mxu1 %vm1709_vm0, %v1705_v5  ;;  %v815_v53 = vpop.permute.xlu0 %814 }
  0xd8   : > { %v739_v54 = vpop.permute.xlu1 %738  ;;  %v812_v55 = vsel %vm810_vm7, %v809_v51, %v811_v52  ;;  %vm799_vm7 = vcmask 326912  }
  0xd9   : > { %1497 = vmatpush3.bf16.msra.mxu0 %v739_v54  ;;  %v817_v56 = vsub.f32 %v812_v55, %v815_v53  ;;  %v310_v54 = vld [vmem:[#allocation3] sm:$0xff] }
  0xda   : > { %1498 = vmatprep.subr.bf16.mxu0 %v1705_v5 }
  0xdb   : > { %v818_v57 = vmul.f32 1.442695, %v817_v56  ;;  %v735_v59 = vpop.permute.xlu0 %734 }
  0xdc   : > { %v841_v58 = vpop.permute.xlu1 %840 }
  0xdd   : > { %1513 = vmatpush3.bf16.msra.mxu1 %v841_v58  ;;  %1654 = vpow2.f32 %v818_v57 }
  0xde   : > { %1514 = vmatprep.subr.bf16.mxu1 %v1705_v5  ;;  %v1653_v60 = vpop.eup %1652 }
  0xdf   : > { %723 = vadd.xlane.f32.xlu0 %v1653_v60  ;;  %v733_v62 = vpop.permute.xlu0 %732  ;;  %v729_v7 = vpack.c.bf16 %v1653_v60, %v1653_v60 }
  0xe0   : > { %v737_v61 = vpop.permute.xlu1 %736 }
  0xe1   : > { %1499 = vmatpush3.bf16.msra.mxu0 %v737_v61 }
  0xe2   : > { %1500 = vmatprep.subr.bf16.mxu0 %v1705_v5 }
  0xe3   : > { %v731_v0 = vpop.permute.xlu0 %730 }
  0xe4   : > { %v839_v63 = vpop.permute.xlu1 %838 }
  0xe5   : > { %1515 = vmatpush3.bf16.msra.mxu1 %v839_v63  ;;  %1501 = vmatpush3.bf16.msra.mxu0 %v735_v59 }
  0xe6   : > { %1516 = vmatprep.subr.bf16.mxu1 %v1705_v5  ;;  %1502 = vmatprep.subr.bf16.mxu0 %v1705_v5 }
  0xe7   : > { %v941_v3 = vpop.permute.xlu0 %940 }
  0xe8   : > { %v837_v1 = vpop.permute.xlu1 %836 }
  0xe9   : > { %1517 = vmatpush3.bf16.msra.mxu1 %v837_v1  ;;  %1503 = vmatpush3.bf16.msra.mxu0 %v733_v62 }
  0xea   : > { %1518 = vmatprep.subr.bf16.mxu1 %v1705_v5  ;;  %1504 = vmatprep.subr.bf16.mxu0 %v1705_v5  ;;  %v1655_v4 = vpop.eup %1654 }
  0xeb   : > { %821 = vadd.xlane.f32.xlu0 %v1655_v4  ;;  %v831_v8 = vpop.permute.xlu0 %830  ;;  %v827_v22 = vpack.c.bf16 %v1655_v4, %v1655_v4 }
  0xec   : > { %v835_v6 = vpop.permute.xlu1 %834 }
  0xed   : > { %1519 = vmatpush3.bf16.msra.mxu1 %v835_v6  ;;  %1505 = vmatpush3.bf16.msra.mxu0 %v731_v0 }
  0xee   : > { %1520 = vmatprep.subr.bf16.mxu1 %v1705_v5  ;;  %1530 = vmatprep.subr.bf16.mxu0 %v1705_v5 }
  0xef   : > { %v829_v12 = vpop.permute.xlu0 %828 }
  0xf0   : > { %v833_v10 = vpop.permute.xlu1 %832  ;;  %1507 = vmatmul.mubr.bf16.vlgmr.msra.gmra.mxu0 %v729_v7 }
  0xf1   : > { %1521 = vmatpush3.bf16.msra.mxu1 %v833_v10  ;;  %1531 = vmatpush3.bf16.msra.mxu0 %v941_v3 }
  0xf2   : > { %1522 = vmatprep.subr.bf16.mxu1 %v1705_v5  ;;  %1532 = vmatprep.subr.bf16.mxu0 %v1705_v5 }
  0xf3   : > { %1546 = vmatprep.mubr.msk.bf16.mxu0 %vm1709_vm0, %v1705_v5  ;;  %v937_v14 = vpop.permute.xlu0 %936 }
  0xf4   : > { %v901_v19 = vpop.permute.xlu1 %900 }
  0xf5   : > { %1523 = vmatpush3.bf16.msra.mxu1 %v831_v8  ;;  %v907_v20 = vadd.f32 %v906_v13, %v901_v19 }
  0xf6   : > { %1524 = vmatprep.subr.bf16.mxu1 %v1705_v5 }
  0xf7   : > { %v909_v25 = vmul.f32 0.2, %v907_v20  ;;  %v999_v27 = vpop.permute.xlu0 %998  ;;  %vm908_vm9 = vcmp.gt.f32.partialorder %v907_v20, 0.0 }
  0xf8   : > { %v939_v23 = vpop.permute.xlu1 %938  ;;  %v1005_v33 = vadd.f32 %v1004_v30, %v999_v27 }
  0xf9   : > { %1525 = vmatpush3.bf16.msra.mxu1 %v829_v12  ;;  %1533 = vmatpush3.bf16.msra.mxu0 %v939_v23  ;;  %v910_v29 = vsel %vm908_vm9, %v907_v20, %v909_v25  ;;  %vm897_vm9 = vcmask 392512  }
  0xfa   : > { %1534 = vmatprep.subr.bf16.mxu0 %v1705_v5  ;;  %1550 = vmatprep.subr.bf16.mxu1 %v1705_v5  ;;  %v1007_v36 = vmul.f32 0.2, %v1005_v33  ;;  %vm1006_vm10 = vcmp.gt.f32.partialorder %v1005_v33, 0.0 }
  0xfb   : > { %v933_v31 = vpop.permute.xlu0 %932 }
  0xfc   : > { %1527 = vmatmul.mubr.bf16.vlgmr.msra.gmra.mxu1 %v827_v22  ;;  %v913_v28 = vpop.permute.xlu1 %912  ;;  %v1008_v24 = vsel %vm1006_vm10, %v1005_v33, %v1007_v36  ;;  %vm995_vm10 = vcmask 458112  }
  0xfd   : > { %1535 = vmatpush3.bf16.msra.mxu0 %v937_v14  ;;  %1566 = vmatprep.mubr.msk.bf16.mxu1 %vm1709_vm0, %v1705_v5  ;;  %v915_v32 = vsub.f32 %v910_v29, %v913_v28  ;;  %vm824_vm0 = vcmask 48168  }
  0xfe   : > { %1536 = vmatprep.subr.bf16.mxu0 %v1705_v5 }
  0xff   : > { %v916_v34 = vmul.f32 1.442695, %v915_v32  ;;  %v1035_v37 = vpop.permute.xlu0 %1034 }
 0x100   : > { %v1039_v21 = vpop.permute.xlu1 %1038 }
 0x101   : > { %1551 = vmatpush3.bf16.msra.mxu1 %v1039_v21  ;;  %1656 = vpow2.f32 %v916_v34 }
 0x102   : > { %1552 = vmatprep.subr.bf16.mxu1 %v1705_v5 }
 0x103   : > { %v1033_v39 = vpop.permute.xlu0 %1032 }
 0x104   : > { %v935_v35 = vpop.permute.xlu1 %934 }
 0x105   : > { %1537 = vmatpush3.bf16.msra.mxu0 %v935_v35 }
 0x106   : > { %1538 = vmatprep.subr.bf16.mxu0 %v1705_v5 }
 0x107   : > { %v1031_v44 = vpop.permute.xlu0 %1030 }
 0x108   : > { %v1037_v38 = vpop.permute.xlu1 %1036 }
 0x109   : > { %1539 = vmatpush3.bf16.msra.mxu0 %v933_v31  ;;  %1553 = vmatpush3.bf16.msra.mxu1 %v1037_v38 }
 0x10a   : > { %1540 = vmatprep.subr.bf16.mxu0 %v1705_v5  ;;  %1554 = vmatprep.subr.bf16.mxu1 %v1705_v5 }
 0x10b   : > { %v1029_v47 = vpop.permute.xlu0 %1028 }
 0x10c   : > { %v1011_v40 = vpop.permute.xlu1 %1010 }
 0x10d   : > { %v1013_v41 = vsub.f32 %v1008_v24, %v1011_v40  ;;  %1555 = vmatpush3.bf16.msra.mxu1 %v1035_v37 }
 0x10e   : > { %1556 = vmatprep.subr.bf16.mxu1 %v1705_v5  ;;  %v2054_v46 = vpop.eup %1656 }
 0x10f   : > { %v1014_v42 = vmul.f32 1.442695, %v1013_v41  ;;  %v925_v49 = vpack.c.bf16 %v2054_v46, %v2054_v46  ;;  %v1025_v52 = vpop.permute.xlu0 %1024 }
 0x110   : > { %v931_v43 = vpop.permute.xlu1 %930 }
 0x111   : > { %1658 = vpow2.f32 %v1014_v42  ;;  %1541 = vmatpush3.bf16.msra.mxu0 %v931_v43  ;;  %1557 = vmatpush3.bf16.msra.mxu1 %v1033_v39 }
 0x112   : > { %1542 = vmatprep.subr.bf16.mxu0 %v1705_v5  ;;  %1558 = vmatprep.subr.bf16.mxu1 %v1705_v5 }
 0x114   : > { %v929_v45 = vpop.permute.xlu1 %928 }
 0x115   : > { %1543 = vmatpush3.bf16.msra.mxu0 %v929_v45  ;;  %1559 = vmatpush3.bf16.msra.mxu1 %v1031_v44 }
 0x116   : > { %1544 = vmatprep.subr.bf16.mxu0 %v1705_v5  ;;  %1560 = vmatprep.subr.bf16.mxu1 %v1705_v5 }
 0x118   : > { %v927_v48 = vpop.permute.xlu1 %926 }
 0x119   : > { %1545 = vmatpush3.bf16.msra.mxu0 %v927_v48  ;;  %1561 = vmatpush3.bf16.msra.mxu1 %v1029_v47 }
 0x11a   : > { %1562 = vmatprep.subr.bf16.mxu1 %v1705_v5 }
 0x11c   : > { %v1027_v50 = vpop.permute.xlu1 %1026  ;;  %1547 = vmatmul.mubr.bf16.vlgmr.msra.gmra.mxu0 %v925_v49 }
 0x11d   : > { %1563 = vmatpush3.bf16.msra.mxu1 %v1027_v50 }
 0x11e   : > { %v1659_v51 = vpop.eup %1658  ;;  %1564 = vmatprep.subr.bf16.mxu1 %v1705_v5  ;;  %v316_v5 = vld [vmem:[#allocation2] sm:$0xff] }
 0x11f   : > { %v1023_v53 = vpack.c.bf16 %v1659_v51, %v1659_v51 }
 0x121   : > { %1565 = vmatpush3.bf16.msra.mxu1 %v1025_v52 }
 0x124   : > { %1567 = vmatmul.mubr.bf16.vlgmr.msra.gmra.mxu1 %v1023_v53 }
 0x13c   : > { %v430_v57 = vpop.xlane.xlu0 %429 }
 0x144   : > { %v528_v60 = vpop.xlane.xlu0 %527 }
 0x14e   : > { %v312_v55 = vpop.xlane.xlu1 %311 }
 0x14f   : > { %v313_v56 = vadd.f32 %v312_v55, %v310_v54 }
 0x150   : > { %v626_v6 = vpop.xlane.xlu0 %625 }
 0x151   : > { %315 = vst.msk [vmem:[#allocation3] sm:$0xff] %vm314_vm11, %v313_v56  ;;  %vm1093_vm11 = vcmask 523712  }
 0x158   : > { %v428_v58 = vld [vmem:[#allocation3] sm:$0xff] }
 0x159   : > { %v431_v59 = vadd.f32 %v430_v57, %v428_v58 }
 0x15b   : > { %433 = vst.msk [vmem:[#allocation3] sm:$0xff] %vm432_vm12, %v431_v59  ;;  %vm1191_vm12 = vcmask 130048  }
 0x162   : > { %v526_v61 = vld [vmem:[#allocation3] sm:$0xff] }
 0x163   : > { %v529_v62 = vadd.f32 %v528_v60, %v526_v61 }
 0x165   : > { %531 = vst.msk [vmem:[#allocation3] sm:$0xff] %vm530_vm13, %v529_v62  ;;  %v400_v63 = vpop.f32.mrf.mxu0  ;;  %vm1193_vm13 = vcmask 195584  }
 0x166   : > { %v406_v0 = vadd.f32 %v400_v63, %v316_v5 }
 0x167   : > { %v1428_v1 = vpop.f32.mrf.mxu0 }
 0x168   : > { %408 = vst.msk [vmem:[#allocation2] sm:$0xff] %vm268_vm5, %v406_v0  ;;  %v724_v12 = vpop.xlane.xlu0 %723 }
 0x169   : > { %v403_v3 = vpop.f32.mrf.mxu0 }
 0x16b   : > { %v1429_v8 = vpop.f32.mrf.mxu0 }
 0x16c   : > { %v624_v4 = vld [vmem:[#allocation3] sm:$0xff] }
 0x16d   : > { %v627_v7 = vadd.f32 %v626_v6, %v624_v4 }
 0x16f   : > { %629 = vst.msk [vmem:[#allocation3] sm:$0xff] %vm628_vm14, %v627_v7  ;;  %v494_v9 = vpop.f32.mrf.mxu1  ;;  %v434_v44 = vld [vmem:[#allocation2] sm:$0xff]  ;;  %vm1195_vm14 = vcmask 261120  }
 0x170   : > { %501 = vrot.lane.b32.xlu1 %v494_v9, %s1719_s29 }
 0x171   : > { %v1448_v10 = vpop.f32.mrf.mxu1 }
 0x173   : > { %v497_v13 = vpop.f32.mrf.mxu1 }
 0x174   : > { %v822_v22 = vpop.xlane.xlu0 %821 }
 0x175   : > { %v1449_v19 = vpop.f32.mrf.mxu1 }
 0x176   : > { %v722_v14 = vld [vmem:[#allocation3] sm:$0xff] }
 0x177   : > { %v725_v20 = vadd.f32 %v724_v12, %v722_v14 }
 0x179   : > { %727 = vst.msk [vmem:[#allocation3] sm:$0xff] %vm726_vm15, %v725_v20 }
 0x180   : > { %v820_v23 = vld [vmem:[#allocation3] sm:$0xff] }
 0x181   : > { %v823_v25 = vadd.f32 %v822_v22, %v820_v23 }
 0x183   : > { %825 = vst.msk [vmem:[#allocation3] sm:$0xff] %vm824_vm0, %v823_v25  ;;  %vm1197_vm0 = vcmask 326656  }
 0x186   : > { %v592_v26 = vpop.f32.mrf.mxu0 }
 0x187   : > { %599 = vrot.lane.b32.xlu0 %v592_v26, %s1720_s30 }
 0x188   : > { %v1468_v27 = vpop.f32.mrf.mxu0 }
 0x18a   : > { %v595_v28 = vpop.f32.mrf.mxu0  ;;  %v918_v55 = vld [vmem:[#allocation3] sm:$0xff] }
 0x18c   : > { %v1469_v29 = vpop.f32.mrf.mxu0 }
 0x194   : > { %v690_v30 = vpop.f32.mrf.mxu1  ;;  %919 = vadd.xlane.f32.xlu1 %v2054_v46 }
 0x196   : > { %v1488_v31 = vpop.f32.mrf.mxu1 }
 0x198   : > { %v693_v32 = vpop.f32.mrf.mxu1 }
 0x19a   : > { %v1489_v21 = vpop.f32.mrf.mxu1 }
 0x1a5   : > { %697 = vrot.lane.b32.xlu1 %v690_v30, %s1721_s5 }
 0x1a6   : > { %1017 = vadd.xlane.f32.xlu0 %v1659_v51 }
 0x1b0   : > { %v788_v33 = vpop.f32.mrf.mxu0 }
 0x1b2   : > { %v1508_v34 = vpop.f32.mrf.mxu0 }
 0x1b4   : > { %v791_v35 = vpop.f32.mrf.mxu0 }
 0x1b6   : > { %v1509_v36 = vpop.f32.mrf.mxu0 }
 0x1bc   : > { %v886_v37 = vpop.f32.mrf.mxu1  ;;  %795 = vrot.lane.b32.xlu0 %v788_v33, %s1722_s6 }
 0x1bd   : > { %893 = vrot.lane.b32.xlu1 %v886_v37, %s1723_s7 }
 0x1be   : > { %v1528_v38 = vpop.f32.mrf.mxu1 }
 0x1c0   : > { %v889_v24 = vpop.f32.mrf.mxu1 }
 0x1c2   : > { %v1529_v39 = vpop.f32.mrf.mxu1 }
 0x1dc   : > { %v984_v40 = vpop.f32.mrf.mxu0 }
 0x1de   : > { %v1548_v41 = vpop.f32.mrf.mxu0 }
 0x1e0   : > { %v987_v42 = vpop.f32.mrf.mxu0 }
 0x1e2   : > { %v1549_v43 = vpop.f32.mrf.mxu0  ;;  %v502_v45 = vpop.permute.xlu1 %501 }
 0x1e3   : > { %v504_v47 = vadd.f32 %v502_v45, %v434_v44 }
 0x1e4   : > { %v1082_v46 = vpop.f32.mrf.mxu1 }
 0x1e5   : > { %506 = vst.msk [vmem:[#allocation2] sm:$0xff] %vm505_vm1, %v504_v47 }
 0x1e6   : > { %v1568_v48 = vpop.f32.mrf.mxu1 }
 0x1e8   : > { %v1085_v49 = vpop.f32.mrf.mxu1 }
 0x1ea   : > { %v1569_v50 = vpop.f32.mrf.mxu1 }
 0x1ec   : > { %v532_v51 = vld [vmem:[#allocation2] sm:$0xff] }
 0x1f9   : > { %v600_v52 = vpop.permute.xlu0 %599 }
 0x1fa   : > { %v602_v53 = vadd.f32 %v600_v52, %v532_v51 }
 0x1fc   : > { %604 = vst.msk [vmem:[#allocation2] sm:$0xff] %vm603_vm2, %v602_v53  ;;  %vm1199_vm2 = vcmask 392192  }
 0x203   : > { %v630_v58 = vld [vmem:[#allocation2] sm:$0xff] }
 0x21d   : > { %v920_v54 = vpop.xlane.xlu1 %919 }
 0x21e   : > { %v921_v56 = vadd.f32 %v920_v54, %v918_v55 }
 0x220   : > { %923 = vst.msk [vmem:[#allocation3] sm:$0xff] %vm922_vm3, %v921_v56 }
 0x221   : > { %v698_v57 = vpop.permute.xlu1 %697 }
 0x222   : > { %v700_v59 = vadd.f32 %v698_v57, %v630_v58 }
 0x224   : > { %702 = vst.msk [vmem:[#allocation2] sm:$0xff] %vm701_vm4, %v700_v59  ;;  %vm1201_vm4 = vcmask 457728  }
 0x227   : > { %v1016_v60 = vld [vmem:[#allocation3] sm:$0xff] }
 0x22b   : > { %v728_v5 = vld [vmem:[#allocation2] sm:$0xff] }
 0x22f   : > { %v1018_v61 = vpop.xlane.xlu0 %1017  ;;  %v894_v3 = vpop.permute.xlu1 %893 }
 0x230   : > { %v1019_v62 = vadd.f32 %v1018_v61, %v1016_v60 }
 0x232   : > { %1021 = vst.msk [vmem:[#allocation3] sm:$0xff] %vm1020_vm6, %v1019_v62 }
 0x233   : > { %v796_v63 = vpop.permute.xlu0 %795 }
 0x234   : > { %v798_v0 = vadd.f32 %v796_v63, %v728_v5 }
 0x236   : > { %800 = vst.msk [vmem:[#allocation2] sm:$0xff] %vm799_vm7, %v798_v0 }
 0x239   : > { %v1099_v1 = vld [vmem:[#allocation3] sm:$0xff] }
 0x23a   : > { %1660 = vrcp.f32 %v1099_v1 }
 0x23d   : > { %v826_v4 = vld [vmem:[#allocation2] sm:$0xff] }
 0x23e   : > { %v896_v6 = vadd.f32 %v894_v3, %v826_v4 }
 0x240   : > { %898 = vst.msk [vmem:[#allocation2] sm:$0xff] %vm897_vm9, %v896_v6 }
 0x247   : > { %v1661_v7 = vpop.eup %1660  ;;  %v924_v8 = vld [vmem:[#allocation2] sm:$0xff] }
 0x248   : > { %1125 = vperm.xlu0 %1629, %v1661_v7   ;;  %1103 = vperm.xlu1 %1627, %v1661_v7  }
 0x24c   : > { %1632 = vset.pattern.permute.xlu0 %v1715_v17  ;;  %991 = vrot.lane.b32.xlu1 %v984_v40, %s1724_s8 }
 0x24d   : > { %1158 = vperm.xlu0 %1632, %v1661_v7   ;;  %1628 = vset.pattern.permute.xlu1 %v1704_v2 }
 0x250   : > { %1114 = vperm.xlu1 %1628, %v1661_v7  }
 0x251   : > { %1635 = vset.pattern.permute.xlu0 %v1716_v18 }
 0x254   : > { %1630 = vset.pattern.permute.xlu1 %v1711_v15 }
 0x255   : > { %1136 = vperm.xlu1 %1630, %v1661_v7  }
 0x259   : > { %1089 = vrot.lane.b32.xlu1 %v1082_v46, %s1725_s9 }
 0x25a   : > { %1631 = vset.pattern.permute.xlu1 %v1712_v16 }
 0x25d   : > { %1147 = vperm.xlu1 %1631, %v1661_v7  }
 0x261   : > { %1633 = vset.pattern.permute.xlu1 %v1707_v11 }
 0x262   : > { %1169 = vperm.xlu1 %1633, %v1661_v7  }
 0x266   : > { %1634 = vset.pattern.permute.xlu1 %v1716_v18 }
 0x267   : > { %1180 = vperm.xlu1 %1634, %v1661_v7  }
 0x2c3   : > { %v1104_v17 = vpop.permute.xlu1 %1103  ;;  %v1126_v19 = vpop.permute.xlu0 %1125 }
 0x2c7   : > { %v992_v2 = vpop.permute.xlu1 %991 }
 0x2c8   : > { %v994_v9 = vadd.f32 %v992_v2, %v924_v8  ;;  %v1159_v22 = vpop.permute.xlu0 %1158 }
 0x2ca   : > { %996 = vst.msk [vmem:[#allocation2] sm:$0xff] %vm995_vm10, %v994_v9 }
 0x2cb   : > { %v1115_v10 = vpop.permute.xlu1 %1114 }
 0x2d0   : > { %v1137_v15 = vpop.permute.xlu1 %1136 }
 0x2d1   : > { %v1022_v13 = vld [vmem:[#allocation2] sm:$0xff] }
 0x2d4   : > { %v1090_v12 = vpop.permute.xlu1 %1089 }
 0x2d5   : > { %v1092_v14 = vadd.f32 %v1090_v12, %v1022_v13 }
 0x2d7   : > { %1094 = vst.msk [vmem:[#allocation2] sm:$0xff] %vm1093_vm11, %v1092_v14 }
 0x2d8   : > { %v1148_v16 = vpop.permute.xlu1 %1147 }
 0x2dd   : > { %v1170_v11 = vpop.permute.xlu1 %1169 }
 0x2de   : > { %v1098_v20 = vld [vmem:[#allocation2] sm:$0xff] }
 0x2df   : > { %v1106_v18 = vmul.f32 %v1104_v17, %v1098_v20  ;;  %v1117_v23 = vmul.f32 %v1115_v10, %v1098_v20  ;;  %v1128_v25 = vmul.f32 %v1126_v19, %v1098_v20  ;;  %v1139_v26 = vmul.f32 %v1137_v15, %v1098_v20 }
 0x2e0   : > { %v1150_v27 = vmul.f32 %v1148_v16, %v1098_v20  ;;  %v2071_v28 = vmul.f32 %v1159_v22, %v1098_v20  ;;  %v2073_v31 = vmul.f32 %v1170_v11, %v1098_v20 }
 0x2e1   : > { %v1108_v29 = vmin.f32 %v1106_v18, 0.0  ;;  %v1119_v30 = vmin.f32 %v1117_v23, 0.0  ;;  %v1130_v32 = vmin.f32 %v1128_v25, 0.0  ;;  %v1141_v21 = vmin.f32 %v1139_v26, 0.0 }
 0x2e2   : > { %v1152_v35 = vmin.f32 %v1150_v27, 0.0  ;;  %v1181_v36 = vpop.permute.xlu1 %1180  ;;  %v1163_v24 = vmin.f32 %v2071_v28, 0.0  ;;  %v1174_v40 = vmin.f32 %v2073_v31, 0.0  ;;  %vm1107_vm15 = vcmp.gt.f32.partialorder %v1106_v18, 0.0 }
 0x2e3   : > { %v1109_v33 = vmul.f32 1.442695, %v1108_v29  ;;  %v1120_v34 = vmul.f32 1.442695, %v1119_v30  ;;  %v1131_v37 = vmul.f32 1.442695, %v1130_v32  ;;  %v1183_v42 = vmul.f32 %v1181_v36, %v1098_v20 }
 0x2e4   : > { %v1142_v38 = vmul.f32 1.442695, %v1141_v21  ;;  %v1153_v39 = vmul.f32 1.442695, %v1152_v35  ;;  %v1164_v41 = vmul.f32 1.442695, %v1163_v24 }
 0x2e5   : > { %1662 = vpow2.f32 %v1109_v33  ;;  %v1175_v43 = vmul.f32 1.442695, %v1174_v40  ;;  %v1185_v44 = vmin.f32 %v1183_v42, 0.0  ;;  %vm1118_vm1 = vcmp.gt.f32.partialorder %v1117_v23, 0.0 }
 0x2e6   : > { %1664 = vpow2.f32 %v1120_v34  ;;  %vm1129_vm3 = vcmp.gt.f32.partialorder %v1128_v25, 0.0  ;;  %vm1140_vm6 = vcmp.gt.f32.partialorder %v1139_v26, 0.0  ;;  %vm1151_vm7 = vcmp.gt.f32.partialorder %v1150_v27, 0.0 }
 0x2e7   : > { %1666 = vpow2.f32 %v1131_v37  ;;  %v1186_v45 = vmul.f32 1.442695, %v1185_v44  ;;  %vm1162_vm9 = vcmp.gt.f32.partialorder %v2071_v28, 0.0  ;;  %vm1184_vm10 = vcmp.gt.f32.partialorder %v1183_v42, 0.0 }
 0x2e8   : > { %1668 = vpow2.f32 %v1142_v38 }
 0x2e9   : > { %1670 = vpow2.f32 %v1153_v39 }
 0x2ea   : > { %1672 = vpow2.f32 %v1164_v41 }
 0x2eb   : > { %1674 = vpow2.f32 %v1175_v43 }
 0x2ec   : > { %1676 = vpow2.f32 %v1186_v45 }
 0x2f2   : > { %v1663_v46 = vpop.eup %1662 }
 0x2f3   : > { %v1665_v47 = vpop.eup %1664  ;;  %v1328_v48 = vadd.f32 -1.0, %v1663_v46 }
 0x2f4   : > { %v1667_v49 = vpop.eup %1666  ;;  %v1329_v50 = vadd.f32 -1.0, %v1665_v47 }
 0x2f5   : > { %v1669_v51 = vpop.eup %1668  ;;  %v1112_v52 = vsel %vm1107_vm15, %v1106_v18, %v1328_v48  ;;  %v1330_v53 = vadd.f32 -1.0, %v1667_v49 }
 0x2f6   : > { %v1671_v54 = vpop.eup %1670  ;;  %v1123_v55 = vsel %vm1118_vm1, %v1117_v23, %v1329_v50  ;;  %v1331_v56 = vadd.f32 -1.0, %v1669_v51 }
 0x2f7   : > { %v1673_v57 = vpop.eup %1672  ;;  %v1134_v58 = vsel %vm1129_vm3, %v1128_v25, %v1330_v53  ;;  %v1332_v59 = vadd.f32 -1.0, %v1671_v54  ;;  %v1190_v60 = vsel %vm268_vm5, %v1112_v52, %v1123_v55  ;;  %vm1173_vm5 = vcmp.gt.f32.partialorder %v2073_v31, 0.0 }
 0x2f8   : > { %v1675_v61 = vpop.eup %1674  ;;  %v1145_v62 = vsel %vm1140_vm6, %v1139_v26, %v1331_v56  ;;  %v1192_v5 = vsel %vm1191_vm12, %v1190_v60, %v1134_v58  ;;  %v1333_v63 = vadd.f32 -1.0, %v1673_v57 }
 0x2f9   : > { %v1677_v0 = vpop.eup %1676  ;;  %v1156_v1 = vsel %vm1151_vm7, %v1150_v27, %v1332_v59  ;;  %v1194_v3 = vsel %vm1193_vm13, %v1192_v5, %v1145_v62  ;;  %v1334_v4 = vadd.f32 -1.0, %v1675_v61 }
 0x2fa   : > { %v1196_v6 = vsel %vm1195_vm14, %v1194_v3, %v1156_v1  ;;  %v1167_v7 = vsel %vm1162_vm9, %v2071_v28, %v1333_v63  ;;  %v1335_v17 = vadd.f32 -1.0, %v1677_v0 }
 0x2fb   : > { %v1178_v2 = vsel %vm1173_vm5, %v2073_v31, %v1334_v4  ;;  %v1198_v8 = vsel %vm1197_vm0, %v1196_v6, %v1167_v7 }
 0x2fc   : > { %v1200_v9 = vsel %vm1199_vm2, %v1198_v8, %v1178_v2  ;;  %v1189_v10 = vsel %vm1184_vm10, %v1183_v42, %v1335_v17 }
 0x2fd   : > { %v1202_v15 = vsel %vm1201_vm4, %v1200_v9, %v1189_v10 }
 0x2fe   : > { %v1204_v12 = vsel %vm266_vm8, %v1202_v15, 0.0 }
 0x2ff   : > { %1205 = vst [vmem:[%s260_s12] sm:$0xff] %v1204_v12 }
 0x300 PF: > { %s14_s17 = sadd.s32 1, %s1700_s17   ;;  %s2107_s15 = smov %s1696_s16 }
 0x301   : > { %p11_p5 = scmp.ge.s32.totalorder %s14_s17, 4   ;;  %s2108_s16 = smov %s2110_s18 }
 0x303   :  { %13 = sbr.rel (!%p11_p5) target bundleno = 2 (0x2), region = 83 }

</bundles_post_ra>
